<compile_context>
chip_gen: v6e
topology: v6e:2x2x1
jax: 0.10.0
libtpu: 0.0.40
codegen_flags: <defaults>
</compile_context>

<pallas_src>
import numpy as np

import jax
import jax.numpy as jnp
from jax import lax
from jax.experimental import pallas as pl
from jax.experimental.pallas import tpu as pltpu


MATMUL_DTYPE = jnp.bfloat16   # MXU input dtype; accumulation is f32 everywhere


def _vmem_limit_bytes():
    """Scoped-VMEM budget: 3/4 of physical, clamped to [32, 96] MiB.
    Safe on v5e/v6e (128 MiB physical) and v7x (64 MiB physical)."""
    try:
        cap = int(pltpu.get_tpu_info().vmem_capacity_bytes)
    except Exception:
        cap = 64 * 1024 * 1024
    return max(32 * 1024 * 1024, min(cap * 3 // 4, 96 * 1024 * 1024))


def _pick_t_tile(B, F, H, C, vmem_budget):
    """Largest time tile (multiple of 8, <= 512) such that the double-buffered
    bf16 x tile, the f32 gate scratch and the resident weights fit the budget
    with ~2x headroom for compiler temporaries."""
    G = 4 * H
    fixed = (2 * ((F * G + H * G + H * C) * 2 + (G + C) * 4 + B * 4)  # residents (dbl-buffered)
             + 2 * B * H * 4 + B * C * 4)                             # h/c scratch + output
    per_t = 2 * B * F * 2 + B * G * 4          # streamed x tile (x2) + gate scratch per step
    avail = max(vmem_budget // 2 - fixed, 8 * per_t)
    t = min(512, avail // per_t)
    return max(8, (t // 8) * 8)


# ---------------------------------------------------------------------------
# Fused kernel: per time tile, project x -> gate pre-activations (MXU, amortized
# over the tile), then run the serial recurrence with (h, c) in persistent VMEM
# scratch; final Linear applied on the last grid step.
# ---------------------------------------------------------------------------
def _lstm_fused_kernel(maxlen_ref,                      # SMEM (1,) scalar prefetch
                       len_ref, x_ref, wih_ref, b_ref, whh_ref, wfc_ref, bfc_ref,
                       out_ref,
                       h_scr, c_scr, gates_scr):
    tile = pl.program_id(0)
    n_tiles = pl.num_programs(0)
    B = x_ref.shape[0]
    t_tile = x_ref.shape[1]
    H = whh_ref.shape[0]

    @pl.when(tile == 0)
    def _init():
        h_scr[...] = jnp.zeros_like(h_scr)
        c_scr[...] = jnp.zeros_like(c_scr)

    t0 = tile * t_tile

    # Skip compute for time tiles entirely past the longest sequence (guard for
    # traced lengths; concrete lengths are already trimmed host-side).
    @pl.when(t0 < maxlen_ref[0])
    def _run_tile():
        # ---- fused input projection for this tile, emitted time-major in VMEM
        w_ih = wih_ref[...]                              # (F, 4H) bf16, resident
        bias = b_ref[...]                                # (1, 4H) f32
        for bi in range(B):                              # static small-B loop
            # TODO(synk): flatten to a single (B*t_tile, F) @ (F, 4H) matmul for large B
            gates_scr[:, bi, :] = (
                jnp.dot(x_ref[bi], w_ih, preferred_element_type=jnp.float32) + bias)

        lengths = len_ref[...]                           # (B, 1) int32
        w_hh = whh_ref[...]                              # (H, 4H) bf16, resident

        def step(s, carry):
            h, c = carry
            g = gates_scr[s] + jnp.dot(                  # (B, 4H) f32
                h.astype(w_hh.dtype), w_hh, preferred_element_type=jnp.float32)
            # slice first, then activate: sigmoid only on i/f/o, tanh only on g
            if_act = jax.nn.sigmoid(g[:, :2 * H])        # PyTorch gate order i,f,g,o
            i_g = if_act[:, :H]
            f_g = if_act[:, H:]
            g_g = jnp.tanh(g[:, 2 * H:3 * H])
            o_g = jax.nn.sigmoid(g[:, 3 * H:])
            c_new = f_g * c + i_g * g_g
            h_new = o_g * jnp.tanh(c_new)
            # pack_padded_sequence semantics: freeze (h, c) once t >= length
            valid = (t0 + s) < lengths                   # (B, 1) bool
            return jnp.where(valid, h_new, h), jnp.where(valid, c_new, c)

        h, c = lax.fori_loop(0, t_tile, step, (h_scr[...], c_scr[...]),
                             unroll=min(t_tile, 8))
        h_scr[...] = h
        c_scr[...] = c

    @pl.when(tile == n_tiles - 1)
    def _finalize():
        # nn.Dropout(p=0.2) is identity in eval mode; no RNG mask here.
        hn = h_scr[...].astype(wfc_ref.dtype)
        out_ref[...] = (jnp.dot(hn, wfc_ref[...], preferred_element_type=jnp.float32)
                        + bfc_ref[...])


# ---------------------------------------------------------------------------
# Wrapper
# ---------------------------------------------------------------------------
def lstm_model_forward(x, lengths, params):
    """x: (B, T, F) batch-first float32, lengths: (B,) ints (descending)."""
    B, T, F = x.shape
    H = params["w_hh"].shape[0]
    G = 4 * H
    C = params["w_fc"].shape[1]

    # --- trim padded tail host-side when lengths are concrete
    T_eff = T
    try:
        T_eff = max(1, min(T, int(np.max(np.asarray(lengths)))))
    except Exception:
        pass  # traced lengths (under jit): rely on the in-kernel skip

    # --- VMEM-budget-derived time tiling
    vmem_limit = _vmem_limit_bytes()
    t_cap = _pick_t_tile(B, F, H, C, vmem_limit)
    if T_eff <= t_cap:
        t_tile, T_pad = T_eff, T_eff
    else:
        t_tile = t_cap
        T_pad = int(pl.cdiv(T_eff, t_tile)) * t_tile
    n_tiles = T_pad // t_tile

    x = x[:, :T_eff, :]
    if T_pad != T_eff:
        # padded timesteps are masked by the length check, values irrelevant
        x = jnp.pad(x, ((0, 0), (0, T_pad - T_eff), (0, 0)))

    x_lp = x.astype(MATMUL_DTYPE)                        # (B, T_pad, F) bf16 stream
    w_ih = params["w_ih"].astype(MATMUL_DTYPE)           # (F, 4H)
    w_hh = params["w_hh"].astype(MATMUL_DTYPE)           # (H, 4H)
    w_fc = params["w_fc"].astype(MATMUL_DTYPE)           # (H, C)
    b = params["b"].astype(jnp.float32)                  # (1, 4H)
    b_fc = params["b_fc"].astype(jnp.float32)            # (1, C)

    len2d = lengths.astype(jnp.int32).reshape(B, 1)
    max_len = jnp.max(lengths).astype(jnp.int32).reshape(1)

    flops = T_pad * B * (2 * F * G + 2 * H * G + 12 * H) + B * 2 * H * C
    transcendentals = T_pad * B * 5 * H
    bytes_accessed = (B * T_pad * F * 2 + (F * G + H * G + H * C) * 2
                      + (G + C) * 4 + B * 4 + B * C * 4)

    grid_spec = pltpu.PrefetchScalarGridSpec(
        num_scalar_prefetch=1,                           # max_len -> SMEM
        grid=(n_tiles,),
        in_specs=[
            pl.BlockSpec((B, 1), lambda t, ml: (0, 0)),            # lengths (resident)
            pl.BlockSpec((B, t_tile, F), lambda t, ml: (0, t, 0)), # raw x tile stream
            pl.BlockSpec((F, G), lambda t, ml: (0, 0)),            # W_ih (resident)
            pl.BlockSpec((1, G), lambda t, ml: (0, 0)),            # b_ih+b_hh (resident)
            pl.BlockSpec((H, G), lambda t, ml: (0, 0)),            # W_hh (resident)
            pl.BlockSpec((H, C), lambda t, ml: (0, 0)),            # W_fc (resident)
            pl.BlockSpec((1, C), lambda t, ml: (0, 0)),            # b_fc (resident)
        ],
        out_specs=pl.BlockSpec((B, C), lambda t, ml: (0, 0)),
        scratch_shapes=[
            pltpu.VMEM((B, H), jnp.float32),             # h state (persistent)
            pltpu.VMEM((B, H), jnp.float32),             # c state (persistent)
            pltpu.VMEM((t_tile, B, G), jnp.float32),     # per-tile gate pre-activations
        ],
    )
    return pl.pallas_call(
        _lstm_fused_kernel,
        out_shape=jax.ShapeDtypeStruct((B, C), jnp.float32),
        grid_spec=grid_spec,
        compiler_params=pltpu.CompilerParams(
            dimension_semantics=("arbitrary",),
            vmem_limit_bytes=vmem_limit),
        cost_estimate=pl.CostEstimate(flops=int(flops),
                                      transcendentals=int(transcendentals),
                                      bytes_accessed=int(bytes_accessed)),
    )(max_len, len2d, x_lp, w_ih, b, w_hh, w_fc, b_fc)


# ---------------------------------------------------------------------------
# Pure-JAX reference with the same dtype recipe (bf16 matmul inputs, f32 accum,
# f32 state/nonlinearities) for a tight numerical check.
# ---------------------------------------------------------------------------
def reference_forward(x, lengths, params):
    B, T, F = x.shape
    H = params["w_hh"].shape[0]
    w_ih = params["w_ih"].astype(MATMUL_DTYPE)
    w_hh = params["w_hh"].astype(MATMUL_DTYPE)
    w_fc = params["w_fc"].astype(MATMUL_DTYPE)

    def step(carry, inp):
        h, c = carry
        x_t, t = inp
        gates = (jnp.dot(x_t.astype(MATMUL_DTYPE), w_ih,
                         preferred_element_type=jnp.float32) + params["b"]
                 + jnp.dot(h.astype(MATMUL_DTYPE), w_hh,
                           preferred_element_type=jnp.float32))
        i_g = jax.nn.sigmoid(gates[:, 0 * H:1 * H])
        f_g = jax.nn.sigmoid(gates[:, 1 * H:2 * H])
        g_g = jnp.tanh(gates[:, 2 * H:3 * H])
        o_g = jax.nn.sigmoid(gates[:, 3 * H:4 * H])
        c_new = f_g * c + i_g * g_g
        h_new = o_g * jnp.tanh(c_new)
        valid = (t < lengths.astype(jnp.int32)).reshape(B, 1)
        return (jnp.where(valid, h_new, h), jnp.where(valid, c_new, c)), None

    x_tm = jnp.transpose(x.astype(jnp.float32), (1, 0, 2))
    (hn, _), _ = lax.scan(
        step,
        (jnp.zeros((B, H), jnp.float32), jnp.zeros((B, H), jnp.float32)),
        (x_tm, jnp.arange(T, dtype=jnp.int32)))
    return (jnp.dot(hn.astype(MATMUL_DTYPE), w_fc,
                    preferred_element_type=jnp.float32) + params["b_fc"])


def init_params(key, input_feat, hidden_dim, n_classes):
    """Deterministic init mirroring PyTorch's default LSTM / Linear init."""
    ks = jax.random.split(key, 6)
    s_lstm = 1.0 / np.sqrt(hidden_dim)
    s_fc = 1.0 / np.sqrt(hidden_dim)   # fc in_features = hidden_dim (num_dir=1)
    w_ih = jax.random.uniform(ks[0], (4 * hidden_dim, input_feat),
                              jnp.float32, -s_lstm, s_lstm)
    w_hh = jax.random.uniform(ks[1], (4 * hidden_dim, hidden_dim),
                              jnp.float32, -s_lstm, s_lstm)
    b_ih = jax.random.uniform(ks[2], (4 * hidden_dim,),
                              jnp.float32, -s_lstm, s_lstm)
    b_hh = jax.random.uniform(ks[3], (4 * hidden_dim,),
                              jnp.float32, -s_lstm, s_lstm)
    w_fc = jax.random.uniform(ks[4], (n_classes, hidden_dim),
                              jnp.float32, -s_fc, s_fc)
    b_fc = jax.random.uniform(ks[5], (n_classes,),
                              jnp.float32, -s_fc, s_fc)
    return {
        "w_ih": jnp.transpose(w_ih),                     # (F, 4H)
        "w_hh": jnp.transpose(w_hh),                     # (H, 4H)
        "b": (b_ih + b_hh).reshape(1, 4 * hidden_dim),   # (1, 4H)
        "w_fc": jnp.transpose(w_fc),                     # (H, C)
        "b_fc": b_fc.reshape(1, n_classes),              # (1, C)
    }


if __name__ == "__main__":
    B, T, F, H, C = 2, 8, 16, 32, 5
    key = jax.random.PRNGKey(0)
    k_x, k_p = jax.random.split(key)

    x = jax.random.normal(k_x, (B, T, F), jnp.float32)
    # pack_padded_sequence requires descending lengths
    lengths = jnp.array([8, 5], dtype=jnp.int32)
    params = init_params(k_p, F, H, C)

    score = jax.block_until_ready(lstm_model_forward(x, lengths, params))
    ref = jax.block_until_ready(reference_forward(x, lengths, params))

    # Both paths use identical bf16-input / f32-accumulation math; 1e-4 only
    # absorbs MXU accumulation-order slack (far below bf16 rounding).
    np.testing.assert_allclose(np.asarray(score), np.asarray(ref),
                               rtol=1e-4, atol=1e-4)
    assert score.shape == (B, C)
    print("KERNEL_OK")
</pallas_src>

<mosaic_0001>
module attributes {stable_mosaic.version = 11 : i64} {
  func.func @_lstm_fused_kernel(%arg0: i32, %arg1: memref<1xi32, #tpu.memory_space<smem>>, %arg2: memref<2x1xi32, #tpu.memory_space<vmem>>, %arg3: memref<2x8x16xbf16, #tpu.memory_space<vmem>>, %arg4: memref<16x128xbf16, #tpu.memory_space<vmem>>, %arg5: memref<1x128xf32, #tpu.memory_space<vmem>>, %arg6: memref<32x128xbf16, #tpu.memory_space<vmem>>, %arg7: memref<32x5xbf16, #tpu.memory_space<vmem>>, %arg8: memref<1x5xf32, #tpu.memory_space<vmem>>, %arg9: memref<2x5xf32, #tpu.memory_space<vmem>>, %arg10: memref<2x32xf32, #tpu.memory_space<vmem>>, %arg11: memref<2x32xf32, #tpu.memory_space<vmem>>, %arg12: memref<8x2x128xf32, #tpu.memory_space<vmem>>) attributes {dimension_semantics = [#tpu.dimension_semantics<arbitrary>], iteration_bounds = array<i64: 1>, scalar_prefetch = 1 : i64, scratch_operands = 3 : i64, tpu.core_type = #tpu.core_type<tc>, window_params = [{pipeline_mode = #tpu.pipeline_mode<synchronous>, transform_indices = @transform_0, window_bounds = array<i64: 2, 1>}, {transform_indices = @transform_1, window_bounds = array<i64: 2, 8, 16>}, {pipeline_mode = #tpu.pipeline_mode<synchronous>, transform_indices = @transform_2, window_bounds = array<i64: 16, 128>}, {pipeline_mode = #tpu.pipeline_mode<synchronous>, transform_indices = @transform_3, window_bounds = array<i64: 1, 128>}, {pipeline_mode = #tpu.pipeline_mode<synchronous>, transform_indices = @transform_4, window_bounds = array<i64: 32, 128>}, {pipeline_mode = #tpu.pipeline_mode<synchronous>, transform_indices = @transform_5, window_bounds = array<i64: 32, 5>}, {pipeline_mode = #tpu.pipeline_mode<synchronous>, transform_indices = @transform_6, window_bounds = array<i64: 1, 5>}, {pipeline_mode = #tpu.pipeline_mode<synchronous>, transform_indices = @transform_7, window_bounds = array<i64: 2, 5>}]} {
    %c0_i32 = arith.constant 0 : i32
    %0 = arith.cmpi eq, %arg0, %c0_i32 : i32
    %1 = arith.extui %0 : i1 to i32
    %c0_i32_0 = arith.constant 0 : i32
    %2 = arith.cmpi ne, %1, %c0_i32_0 : i32
    scf.if %2 {
      %cst = arith.constant 0.000000e+00 : f32
      %11 = vector.broadcast %cst : f32 to vector<2x32xf32>
      %c0_4 = arith.constant 0 : index
      %c0_5 = arith.constant 0 : index
      %12 = vector.load %arg10[%c0_4, %c0_5] : memref<2x32xf32, #tpu.memory_space<vmem>>, vector<2x32xf32>
      tpu.vector_store %arg10[%c0_4, %c0_5], %11 {strides = array<i32>} : memref<2x32xf32, #tpu.memory_space<vmem>>, vector<2x32xf32>,
      %cst_6 = arith.constant 0.000000e+00 : f32
      %13 = vector.broadcast %cst_6 : f32 to vector<2x32xf32>
      %c0_7 = arith.constant 0 : index
      %c0_8 = arith.constant 0 : index
      %14 = vector.load %arg11[%c0_7, %c0_8] : memref<2x32xf32, #tpu.memory_space<vmem>>, vector<2x32xf32>
      tpu.vector_store %arg11[%c0_7, %c0_8], %13 {strides = array<i32>} : memref<2x32xf32, #tpu.memory_space<vmem>>, vector<2x32xf32>,
    } else {
    }
    %c8_i32 = arith.constant 8 : i32
    %3 = arith.muli %arg0, %c8_i32 : i32
    %c0 = arith.constant 0 : index
    %4 = memref.load %arg1[%c0] : memref<1xi32, #tpu.memory_space<smem>>
    %5 = arith.cmpi slt, %3, %4 : i32
    %6 = arith.extui %5 : i1 to i32
    %c0_i32_1 = arith.constant 0 : i32
    %7 = arith.cmpi ne, %6, %c0_i32_1 : i32
    scf.if %7 {
      %c0_4 = arith.constant 0 : index
      %c0_5 = arith.constant 0 : index
      %11 = vector.load %arg4[%c0_4, %c0_5] : memref<16x128xbf16, #tpu.memory_space<vmem>>, vector<16x128xbf16>
      %c0_6 = arith.constant 0 : index
      %c0_7 = arith.constant 0 : index
      %12 = vector.load %arg5[%c0_6, %c0_7] : memref<1x128xf32, #tpu.memory_space<vmem>>, vector<1x128xf32>
      %c0_8 = arith.constant 0 : index
      %c0_9 = arith.constant 0 : index
      %c0_10 = arith.constant 0 : index
      %13 = vector.load %arg3[%c0_8, %c0_9, %c0_10] : memref<2x8x16xbf16, #tpu.memory_space<vmem>>, vector<1x8x16xbf16>
      %14 = vector.shape_cast %13 : vector<1x8x16xbf16> to vector<8x16xbf16>
      %cst = arith.constant dense<0.000000e+00> : vector<8x128xf32>
      %15 = tpu.matmul %14, %11, %cst {dimension_numbers = #tpu.dot_dimension_numbers<[1], [0], [0], [1], [0, 0, 1, 1], [], []>} : vector<8x16xbf16>, vector<16x128xbf16>, vector<8x128xf32> -> vector<8x128xf32>
      %16 = vector.broadcast %12 : vector<1x128xf32> to vector<8x128xf32>
      %17 = arith.addf %15, %16 : vector<8x128xf32>
      %c0_11 = arith.constant 0 : index
      %c0_12 = arith.constant 0 : index
      %c0_13 = arith.constant 0 : index
      %18 = vector.load %arg12[%c0_11, %c0_12, %c0_13] : memref<8x2x128xf32, #tpu.memory_space<vmem>>, vector<8x1x128xf32>
      %19 = vector.shape_cast %18 : vector<8x1x128xf32> to vector<8x128xf32>
      %20 = vector.shape_cast %17 : vector<8x128xf32> to vector<8x1x128xf32>
      tpu.vector_store %arg12[%c0_11, %c0_12, %c0_13], %20 {strides = array<i32>} : memref<8x2x128xf32, #tpu.memory_space<vmem>>, vector<8x1x128xf32>,
      %c1 = arith.constant 1 : index
      %c0_14 = arith.constant 0 : index
      %c0_15 = arith.constant 0 : index
      %21 = vector.load %arg3[%c1, %c0_14, %c0_15] : memref<2x8x16xbf16, #tpu.memory_space<vmem>>, vector<1x8x16xbf16>
      %22 = vector.shape_cast %21 : vector<1x8x16xbf16> to vector<8x16xbf16>
      %cst_16 = arith.constant dense<0.000000e+00> : vector<8x128xf32>
      %23 = tpu.matmul %22, %11, %cst_16 {dimension_numbers = #tpu.dot_dimension_numbers<[1], [0], [0], [1], [0, 0, 1, 1], [], []>} : vector<8x16xbf16>, vector<16x128xbf16>, vector<8x128xf32> -> vector<8x128xf32>
      %24 = vector.broadcast %12 : vector<1x128xf32> to vector<8x128xf32>
      %25 = arith.addf %23, %24 : vector<8x128xf32>
      %c0_17 = arith.constant 0 : index
      %c1_18 = arith.constant 1 : index
      %c0_19 = arith.constant 0 : index
      %26 = vector.load %arg12[%c0_17, %c1_18, %c0_19] : memref<8x2x128xf32, #tpu.memory_space<vmem>>, vector<8x1x128xf32>
      %27 = vector.shape_cast %26 : vector<8x1x128xf32> to vector<8x128xf32>
      %28 = vector.shape_cast %25 : vector<8x128xf32> to vector<8x1x128xf32>
      tpu.vector_store %arg12[%c0_17, %c1_18, %c0_19], %28 {strides = array<i32>} : memref<8x2x128xf32, #tpu.memory_space<vmem>>, vector<8x1x128xf32>,
      %c0_20 = arith.constant 0 : index
      %c0_21 = arith.constant 0 : index
      %29 = vector.load %arg2[%c0_20, %c0_21] : memref<2x1xi32, #tpu.memory_space<vmem>>, vector<2x1xi32>
      %c0_22 = arith.constant 0 : index
      %c0_23 = arith.constant 0 : index
      %30 = vector.load %arg6[%c0_22, %c0_23] : memref<32x128xbf16, #tpu.memory_space<vmem>>, vector<32x128xbf16>
      %c0_24 = arith.constant 0 : index
      %c0_25 = arith.constant 0 : index
      %31 = vector.load %arg10[%c0_24, %c0_25] : memref<2x32xf32, #tpu.memory_space<vmem>>, vector<2x32xf32>
      %c0_26 = arith.constant 0 : index
      %c0_27 = arith.constant 0 : index
      %32 = vector.load %arg11[%c0_26, %c0_27] : memref<2x32xf32, #tpu.memory_space<vmem>>, vector<2x32xf32>
      %c0_i32_28 = arith.constant 0 : i32
      %33 = arith.index_cast %c0_i32_28 : i32 to index
      %c0_29 = arith.constant 0 : index
      %c0_30 = arith.constant 0 : index
      %34 = vector.load %arg12[%33, %c0_29, %c0_30] : memref<8x2x128xf32, #tpu.memory_space<vmem>>, vector<1x2x128xf32>
      %35 = vector.shape_cast %34 : vector<1x2x128xf32> to vector<2x128xf32>
      %36 = arith.truncf %31 : vector<2x32xf32> to vector<2x32xbf16>
      %cst_31 = arith.constant dense<0.000000e+00> : vector<2x128xf32>
      %37 = tpu.matmul %36, %30, %cst_31 {dimension_numbers = #tpu.dot_dimension_numbers<[1], [0], [0], [1], [0, 0, 1, 1], [], []>} : vector<2x32xbf16>, vector<32x128xbf16>, vector<2x128xf32> -> vector<2x128xf32>
      %38 = arith.addf %35, %37 : vector<2x128xf32>
      %39 = vector.extract_strided_slice %38 {offsets = [0, 0], sizes = [2, 64], strides = [1, 1]} : vector<2x128xf32> to vector<2x64xf32>
      %40 = arith.negf %39 : vector<2x64xf32>
      %41 = math.exp %40 : vector<2x64xf32>
      %cst_32 = arith.constant 1.000000e+00 : f32
      %42 = vector.broadcast %cst_32 : f32 to vector<2x64xf32>
      %43 = arith.addf %42, %41 : vector<2x64xf32>
      %44 = arith.divf %42, %43 : vector<2x64xf32>
      %45 = vector.extract_strided_slice %44 {offsets = [0, 0], sizes = [2, 32], strides = [1, 1]} : vector<2x64xf32> to vector<2x32xf32>
      %46 = vector.extract_strided_slice %44 {offsets = [0, 32], sizes = [2, 32], strides = [1, 1]} : vector<2x64xf32> to vector<2x32xf32>
      %47 = vector.extract_strided_slice %38 {offsets = [0, 64], sizes = [2, 32], strides = [1, 1]} : vector<2x128xf32> to vector<2x32xf32>
      %48 = math.tanh %47 : vector<2x32xf32>
      %49 = vector.extract_strided_slice %38 {offsets = [0, 96], sizes = [2, 32], strides = [1, 1]} : vector<2x128xf32> to vector<2x32xf32>
      %50 = arith.negf %49 : vector<2x32xf32>
      %51 = math.exp %50 : vector<2x32xf32>
      %cst_33 = arith.constant 1.000000e+00 : f32
      %52 = vector.broadcast %cst_33 : f32 to vector<2x32xf32>
      %53 = arith.addf %52, %51 : vector<2x32xf32>
      %54 = arith.divf %52, %53 : vector<2x32xf32>
      %55 = arith.mulf %46, %32 : vector<2x32xf32>
      %56 = arith.mulf %45, %48 : vector<2x32xf32>
      %57 = arith.addf %55, %56 : vector<2x32xf32>
      %58 = math.tanh %57 : vector<2x32xf32>
      %59 = arith.mulf %54, %58 : vector<2x32xf32>
      %60 = arith.addi %3, %c0_i32_28 : i32
      %61 = vector.broadcast %60 : i32 to vector<2x1xi32>
      %62 = arith.cmpi slt, %61, %29 : vector<2x1xi32>
      %63 = vector.shape_cast %62 : vector<2x1xi1> to vector<2x1xi1>
      %64 = vector.broadcast %63 : vector<2x1xi1> to vector<2x32xi1>
      %65 = arith.select %64, %59, %31 : vector<2x32xi1>, vector<2x32xf32>
      %66 = vector.shape_cast %62 : vector<2x1xi1> to vector<2x1xi1>
      %67 = vector.broadcast %66 : vector<2x1xi1> to vector<2x32xi1>
      %68 = arith.select %67, %57, %32 : vector<2x32xi1>, vector<2x32xf32>
      %c1_i32 = arith.constant 1 : i32
      %69 = arith.index_cast %c1_i32 : i32 to index
      %c0_34 = arith.constant 0 : index
      %c0_35 = arith.constant 0 : index
      %70 = vector.load %arg12[%69, %c0_34, %c0_35] : memref<8x2x128xf32, #tpu.memory_space<vmem>>, vector<1x2x128xf32>
      %71 = vector.shape_cast %70 : vector<1x2x128xf32> to vector<2x128xf32>
      %72 = arith.truncf %65 : vector<2x32xf32> to vector<2x32xbf16>
      %cst_36 = arith.constant dense<0.000000e+00> : vector<2x128xf32>
      %73 = tpu.matmul %72, %30, %cst_36 {dimension_numbers = #tpu.dot_dimension_numbers<[1], [0], [0], [1], [0, 0, 1, 1], [], []>} : vector<2x32xbf16>, vector<32x128xbf16>, vector<2x128xf32> -> vector<2x128xf32>
      %74 = arith.addf %71, %73 : vector<2x128xf32>
      %75 = vector.extract_strided_slice %74 {offsets = [0, 0], sizes = [2, 64], strides = [1, 1]} : vector<2x128xf32> to vector<2x64xf32>
      %76 = arith.negf %75 : vector<2x64xf32>
      %77 = math.exp %76 : vector<2x64xf32>
      %cst_37 = arith.constant 1.000000e+00 : f32
      %78 = vector.broadcast %cst_37 : f32 to vector<2x64xf32>
      %79 = arith.addf %78, %77 : vector<2x64xf32>
      %80 = arith.divf %78, %79 : vector<2x64xf32>
      %81 = vector.extract_strided_slice %80 {offsets = [0, 0], sizes = [2, 32], strides = [1, 1]} : vector<2x64xf32> to vector<2x32xf32>
      %82 = vector.extract_strided_slice %80 {offsets = [0, 32], sizes = [2, 32], strides = [1, 1]} : vector<2x64xf32> to vector<2x32xf32>
      %83 = vector.extract_strided_slice %74 {offsets = [0, 64], sizes = [2, 32], strides = [1, 1]} : vector<2x128xf32> to vector<2x32xf32>
      %84 = math.tanh %83 : vector<2x32xf32>
      %85 = vector.extract_strided_slice %74 {offsets = [0, 96], sizes = [2, 32], strides = [1, 1]} : vector<2x128xf32> to vector<2x32xf32>
      %86 = arith.negf %85 : vector<2x32xf32>
      %87 = math.exp %86 : vector<2x32xf32>
      %cst_38 = arith.constant 1.000000e+00 : f32
      %88 = vector.broadcast %cst_38 : f32 to vector<2x32xf32>
      %89 = arith.addf %88, %87 : vector<2x32xf32>
      %90 = arith.divf %88, %89 : vector<2x32xf32>
      %91 = arith.mulf %82, %68 : vector<2x32xf32>
      %92 = arith.mulf %81, %84 : vector<2x32xf32>
      %93 = arith.addf %91, %92 : vector<2x32xf32>
      %94 = math.tanh %93 : vector<2x32xf32>
      %95 = arith.mulf %90, %94 : vector<2x32xf32>
      %96 = arith.addi %3, %c1_i32 : i32
      %97 = vector.broadcast %96 : i32 to vector<2x1xi32>
      %98 = arith.cmpi slt, %97, %29 : vector<2x1xi32>
      %99 = vector.shape_cast %98 : vector<2x1xi1> to vector<2x1xi1>
      %100 = vector.broadcast %99 : vector<2x1xi1> to vector<2x32xi1>
      %101 = arith.select %100, %95, %65 : vector<2x32xi1>, vector<2x32xf32>
      %102 = vector.shape_cast %98 : vector<2x1xi1> to vector<2x1xi1>
      %103 = vector.broadcast %102 : vector<2x1xi1> to vector<2x32xi1>
      %104 = arith.select %103, %93, %68 : vector<2x32xi1>, vector<2x32xf32>
      %c2_i32 = arith.constant 2 : i32
      %105 = arith.index_cast %c2_i32 : i32 to index
      %c0_39 = arith.constant 0 : index
      %c0_40 = arith.constant 0 : index
      %106 = vector.load %arg12[%105, %c0_39, %c0_40] : memref<8x2x128xf32, #tpu.memory_space<vmem>>, vector<1x2x128xf32>
      %107 = vector.shape_cast %106 : vector<1x2x128xf32> to vector<2x128xf32>
      %108 = arith.truncf %101 : vector<2x32xf32> to vector<2x32xbf16>
      %cst_41 = arith.constant dense<0.000000e+00> : vector<2x128xf32>
      %109 = tpu.matmul %108, %30, %cst_41 {dimension_numbers = #tpu.dot_dimension_numbers<[1], [0], [0], [1], [0, 0, 1, 1], [], []>} : vector<2x32xbf16>, vector<32x128xbf16>, vector<2x128xf32> -> vector<2x128xf32>
      %110 = arith.addf %107, %109 : vector<2x128xf32>
      %111 = vector.extract_strided_slice %110 {offsets = [0, 0], sizes = [2, 64], strides = [1, 1]} : vector<2x128xf32> to vector<2x64xf32>
      %112 = arith.negf %111 : vector<2x64xf32>
      %113 = math.exp %112 : vector<2x64xf32>
      %cst_42 = arith.constant 1.000000e+00 : f32
      %114 = vector.broadcast %cst_42 : f32 to vector<2x64xf32>
      %115 = arith.addf %114, %113 : vector<2x64xf32>
      %116 = arith.divf %114, %115 : vector<2x64xf32>
      %117 = vector.extract_strided_slice %116 {offsets = [0, 0], sizes = [2, 32], strides = [1, 1]} : vector<2x64xf32> to vector<2x32xf32>
      %118 = vector.extract_strided_slice %116 {offsets = [0, 32], sizes = [2, 32], strides = [1, 1]} : vector<2x64xf32> to vector<2x32xf32>
      %119 = vector.extract_strided_slice %110 {offsets = [0, 64], sizes = [2, 32], strides = [1, 1]} : vector<2x128xf32> to vector<2x32xf32>
      %120 = math.tanh %119 : vector<2x32xf32>
      %121 = vector.extract_strided_slice %110 {offsets = [0, 96], sizes = [2, 32], strides = [1, 1]} : vector<2x128xf32> to vector<2x32xf32>
      %122 = arith.negf %121 : vector<2x32xf32>
      %123 = math.exp %122 : vector<2x32xf32>
      %cst_43 = arith.constant 1.000000e+00 : f32
      %124 = vector.broadcast %cst_43 : f32 to vector<2x32xf32>
      %125 = arith.addf %124, %123 : vector<2x32xf32>
      %126 = arith.divf %124, %125 : vector<2x32xf32>
      %127 = arith.mulf %118, %104 : vector<2x32xf32>
      %128 = arith.mulf %117, %120 : vector<2x32xf32>
      %129 = arith.addf %127, %128 : vector<2x32xf32>
      %130 = math.tanh %129 : vector<2x32xf32>
      %131 = arith.mulf %126, %130 : vector<2x32xf32>
      %132 = arith.addi %3, %c2_i32 : i32
      %133 = vector.broadcast %132 : i32 to vector<2x1xi32>
      %134 = arith.cmpi slt, %133, %29 : vector<2x1xi32>
      %135 = vector.shape_cast %134 : vector<2x1xi1> to vector<2x1xi1>
      %136 = vector.broadcast %135 : vector<2x1xi1> to vector<2x32xi1>
      %137 = arith.select %136, %131, %101 : vector<2x32xi1>, vector<2x32xf32>
      %138 = vector.shape_cast %134 : vector<2x1xi1> to vector<2x1xi1>
      %139 = vector.broadcast %138 : vector<2x1xi1> to vector<2x32xi1>
      %140 = arith.select %139, %129, %104 : vector<2x32xi1>, vector<2x32xf32>
      %c3_i32 = arith.constant 3 : i32
      %141 = arith.index_cast %c3_i32 : i32 to index
      %c0_44 = arith.constant 0 : index
      %c0_45 = arith.constant 0 : index
      %142 = vector.load %arg12[%141, %c0_44, %c0_45] : memref<8x2x128xf32, #tpu.memory_space<vmem>>, vector<1x2x128xf32>
      %143 = vector.shape_cast %142 : vector<1x2x128xf32> to vector<2x128xf32>
      %144 = arith.truncf %137 : vector<2x32xf32> to vector<2x32xbf16>
      %cst_46 = arith.constant dense<0.000000e+00> : vector<2x128xf32>
      %145 = tpu.matmul %144, %30, %cst_46 {dimension_numbers = #tpu.dot_dimension_numbers<[1], [0], [0], [1], [0, 0, 1, 1], [], []>} : vector<2x32xbf16>, vector<32x128xbf16>, vector<2x128xf32> -> vector<2x128xf32>
      %146 = arith.addf %143, %145 : vector<2x128xf32>
      %147 = vector.extract_strided_slice %146 {offsets = [0, 0], sizes = [2, 64], strides = [1, 1]} : vector<2x128xf32> to vector<2x64xf32>
      %148 = arith.negf %147 : vector<2x64xf32>
      %149 = math.exp %148 : vector<2x64xf32>
      %cst_47 = arith.constant 1.000000e+00 : f32
      %150 = vector.broadcast %cst_47 : f32 to vector<2x64xf32>
      %151 = arith.addf %150, %149 : vector<2x64xf32>
      %152 = arith.divf %150, %151 : vector<2x64xf32>
      %153 = vector.extract_strided_slice %152 {offsets = [0, 0], sizes = [2, 32], strides = [1, 1]} : vector<2x64xf32> to vector<2x32xf32>
      %154 = vector.extract_strided_slice %152 {offsets = [0, 32], sizes = [2, 32], strides = [1, 1]} : vector<2x64xf32> to vector<2x32xf32>
      %155 = vector.extract_strided_slice %146 {offsets = [0, 64], sizes = [2, 32], strides = [1, 1]} : vector<2x128xf32> to vector<2x32xf32>
      %156 = math.tanh %155 : vector<2x32xf32>
      %157 = vector.extract_strided_slice %146 {offsets = [0, 96], sizes = [2, 32], strides = [1, 1]} : vector<2x128xf32> to vector<2x32xf32>
      %158 = arith.negf %157 : vector<2x32xf32>
      %159 = math.exp %158 : vector<2x32xf32>
      %cst_48 = arith.constant 1.000000e+00 : f32
      %160 = vector.broadcast %cst_48 : f32 to vector<2x32xf32>
      %161 = arith.addf %160, %159 : vector<2x32xf32>
      %162 = arith.divf %160, %161 : vector<2x32xf32>
      %163 = arith.mulf %154, %140 : vector<2x32xf32>
      %164 = arith.mulf %153, %156 : vector<2x32xf32>
      %165 = arith.addf %163, %164 : vector<2x32xf32>
      %166 = math.tanh %165 : vector<2x32xf32>
      %167 = arith.mulf %162, %166 : vector<2x32xf32>
      %168 = arith.addi %3, %c3_i32 : i32
      %169 = vector.broadcast %168 : i32 to vector<2x1xi32>
      %170 = arith.cmpi slt, %169, %29 : vector<2x1xi32>
      %171 = vector.shape_cast %170 : vector<2x1xi1> to vector<2x1xi1>
      %172 = vector.broadcast %171 : vector<2x1xi1> to vector<2x32xi1>
      %173 = arith.select %172, %167, %137 : vector<2x32xi1>, vector<2x32xf32>
      %174 = vector.shape_cast %170 : vector<2x1xi1> to vector<2x1xi1>
      %175 = vector.broadcast %174 : vector<2x1xi1> to vector<2x32xi1>
      %176 = arith.select %175, %165, %140 : vector<2x32xi1>, vector<2x32xf32>
      %c4_i32 = arith.constant 4 : i32
      %177 = arith.index_cast %c4_i32 : i32 to index
      %c0_49 = arith.constant 0 : index
      %c0_50 = arith.constant 0 : index
      %178 = vector.load %arg12[%177, %c0_49, %c0_50] : memref<8x2x128xf32, #tpu.memory_space<vmem>>, vector<1x2x128xf32>
      %179 = vector.shape_cast %178 : vector<1x2x128xf32> to vector<2x128xf32>
      %180 = arith.truncf %173 : vector<2x32xf32> to vector<2x32xbf16>
      %cst_51 = arith.constant dense<0.000000e+00> : vector<2x128xf32>
      %181 = tpu.matmul %180, %30, %cst_51 {dimension_numbers = #tpu.dot_dimension_numbers<[1], [0], [0], [1], [0, 0, 1, 1], [], []>} : vector<2x32xbf16>, vector<32x128xbf16>, vector<2x128xf32> -> vector<2x128xf32>
      %182 = arith.addf %179, %181 : vector<2x128xf32>
      %183 = vector.extract_strided_slice %182 {offsets = [0, 0], sizes = [2, 64], strides = [1, 1]} : vector<2x128xf32> to vector<2x64xf32>
      %184 = arith.negf %183 : vector<2x64xf32>
      %185 = math.exp %184 : vector<2x64xf32>
      %cst_52 = arith.constant 1.000000e+00 : f32
      %186 = vector.broadcast %cst_52 : f32 to vector<2x64xf32>
      %187 = arith.addf %186, %185 : vector<2x64xf32>
      %188 = arith.divf %186, %187 : vector<2x64xf32>
      %189 = vector.extract_strided_slice %188 {offsets = [0, 0], sizes = [2, 32], strides = [1, 1]} : vector<2x64xf32> to vector<2x32xf32>
      %190 = vector.extract_strided_slice %188 {offsets = [0, 32], sizes = [2, 32], strides = [1, 1]} : vector<2x64xf32> to vector<2x32xf32>
      %191 = vector.extract_strided_slice %182 {offsets = [0, 64], sizes = [2, 32], strides = [1, 1]} : vector<2x128xf32> to vector<2x32xf32>
      %192 = math.tanh %191 : vector<2x32xf32>
      %193 = vector.extract_strided_slice %182 {offsets = [0, 96], sizes = [2, 32], strides = [1, 1]} : vector<2x128xf32> to vector<2x32xf32>
      %194 = arith.negf %193 : vector<2x32xf32>
      %195 = math.exp %194 : vector<2x32xf32>
      %cst_53 = arith.constant 1.000000e+00 : f32
      %196 = vector.broadcast %cst_53 : f32 to vector<2x32xf32>
      %197 = arith.addf %196, %195 : vector<2x32xf32>
      %198 = arith.divf %196, %197 : vector<2x32xf32>
      %199 = arith.mulf %190, %176 : vector<2x32xf32>
      %200 = arith.mulf %189, %192 : vector<2x32xf32>
      %201 = arith.addf %199, %200 : vector<2x32xf32>
      %202 = math.tanh %201 : vector<2x32xf32>
      %203 = arith.mulf %198, %202 : vector<2x32xf32>
      %204 = arith.addi %3, %c4_i32 : i32
      %205 = vector.broadcast %204 : i32 to vector<2x1xi32>
      %206 = arith.cmpi slt, %205, %29 : vector<2x1xi32>
      %207 = vector.shape_cast %206 : vector<2x1xi1> to vector<2x1xi1>
      %208 = vector.broadcast %207 : vector<2x1xi1> to vector<2x32xi1>
      %209 = arith.select %208, %203, %173 : vector<2x32xi1>, vector<2x32xf32>
      %210 = vector.shape_cast %206 : vector<2x1xi1> to vector<2x1xi1>
      %211 = vector.broadcast %210 : vector<2x1xi1> to vector<2x32xi1>
      %212 = arith.select %211, %201, %176 : vector<2x32xi1>, vector<2x32xf32>
      %c5_i32 = arith.constant 5 : i32
      %213 = arith.index_cast %c5_i32 : i32 to index
      %c0_54 = arith.constant 0 : index
      %c0_55 = arith.constant 0 : index
      %214 = vector.load %arg12[%213, %c0_54, %c0_55] : memref<8x2x128xf32, #tpu.memory_space<vmem>>, vector<1x2x128xf32>
      %215 = vector.shape_cast %214 : vector<1x2x128xf32> to vector<2x128xf32>
      %216 = arith.truncf %209 : vector<2x32xf32> to vector<2x32xbf16>
      %cst_56 = arith.constant dense<0.000000e+00> : vector<2x128xf32>
      %217 = tpu.matmul %216, %30, %cst_56 {dimension_numbers = #tpu.dot_dimension_numbers<[1], [0], [0], [1], [0, 0, 1, 1], [], []>} : vector<2x32xbf16>, vector<32x128xbf16>, vector<2x128xf32> -> vector<2x128xf32>
      %218 = arith.addf %215, %217 : vector<2x128xf32>
      %219 = vector.extract_strided_slice %218 {offsets = [0, 0], sizes = [2, 64], strides = [1, 1]} : vector<2x128xf32> to vector<2x64xf32>
      %220 = arith.negf %219 : vector<2x64xf32>
      %221 = math.exp %220 : vector<2x64xf32>
      %cst_57 = arith.constant 1.000000e+00 : f32
      %222 = vector.broadcast %cst_57 : f32 to vector<2x64xf32>
      %223 = arith.addf %222, %221 : vector<2x64xf32>
      %224 = arith.divf %222, %223 : vector<2x64xf32>
      %225 = vector.extract_strided_slice %224 {offsets = [0, 0], sizes = [2, 32], strides = [1, 1]} : vector<2x64xf32> to vector<2x32xf32>
      %226 = vector.extract_strided_slice %224 {offsets = [0, 32], sizes = [2, 32], strides = [1, 1]} : vector<2x64xf32> to vector<2x32xf32>
      %227 = vector.extract_strided_slice %218 {offsets = [0, 64], sizes = [2, 32], strides = [1, 1]} : vector<2x128xf32> to vector<2x32xf32>
      %228 = math.tanh %227 : vector<2x32xf32>
      %229 = vector.extract_strided_slice %218 {offsets = [0, 96], sizes = [2, 32], strides = [1, 1]} : vector<2x128xf32> to vector<2x32xf32>
      %230 = arith.negf %229 : vector<2x32xf32>
      %231 = math.exp %230 : vector<2x32xf32>
      %cst_58 = arith.constant 1.000000e+00 : f32
      %232 = vector.broadcast %cst_58 : f32 to vector<2x32xf32>
      %233 = arith.addf %232, %231 : vector<2x32xf32>
      %234 = arith.divf %232, %233 : vector<2x32xf32>
      %235 = arith.mulf %226, %212 : vector<2x32xf32>
      %236 = arith.mulf %225, %228 : vector<2x32xf32>
      %237 = arith.addf %235, %236 : vector<2x32xf32>
      %238 = math.tanh %237 : vector<2x32xf32>
      %239 = arith.mulf %234, %238 : vector<2x32xf32>
      %240 = arith.addi %3, %c5_i32 : i32
      %241 = vector.broadcast %240 : i32 to vector<2x1xi32>
      %242 = arith.cmpi slt, %241, %29 : vector<2x1xi32>
      %243 = vector.shape_cast %242 : vector<2x1xi1> to vector<2x1xi1>
      %244 = vector.broadcast %243 : vector<2x1xi1> to vector<2x32xi1>
      %245 = arith.select %244, %239, %209 : vector<2x32xi1>, vector<2x32xf32>
      %246 = vector.shape_cast %242 : vector<2x1xi1> to vector<2x1xi1>
      %247 = vector.broadcast %246 : vector<2x1xi1> to vector<2x32xi1>
      %248 = arith.select %247, %237, %212 : vector<2x32xi1>, vector<2x32xf32>
      %c6_i32 = arith.constant 6 : i32
      %249 = arith.index_cast %c6_i32 : i32 to index
      %c0_59 = arith.constant 0 : index
      %c0_60 = arith.constant 0 : index
      %250 = vector.load %arg12[%249, %c0_59, %c0_60] : memref<8x2x128xf32, #tpu.memory_space<vmem>>, vector<1x2x128xf32>
      %251 = vector.shape_cast %250 : vector<1x2x128xf32> to vector<2x128xf32>
      %252 = arith.truncf %245 : vector<2x32xf32> to vector<2x32xbf16>
      %cst_61 = arith.constant dense<0.000000e+00> : vector<2x128xf32>
      %253 = tpu.matmul %252, %30, %cst_61 {dimension_numbers = #tpu.dot_dimension_numbers<[1], [0], [0], [1], [0, 0, 1, 1], [], []>} : vector<2x32xbf16>, vector<32x128xbf16>, vector<2x128xf32> -> vector<2x128xf32>
      %254 = arith.addf %251, %253 : vector<2x128xf32>
      %255 = vector.extract_strided_slice %254 {offsets = [0, 0], sizes = [2, 64], strides = [1, 1]} : vector<2x128xf32> to vector<2x64xf32>
      %256 = arith.negf %255 : vector<2x64xf32>
      %257 = math.exp %256 : vector<2x64xf32>
      %cst_62 = arith.constant 1.000000e+00 : f32
      %258 = vector.broadcast %cst_62 : f32 to vector<2x64xf32>
      %259 = arith.addf %258, %257 : vector<2x64xf32>
      %260 = arith.divf %258, %259 : vector<2x64xf32>
      %261 = vector.extract_strided_slice %260 {offsets = [0, 0], sizes = [2, 32], strides = [1, 1]} : vector<2x64xf32> to vector<2x32xf32>
      %262 = vector.extract_strided_slice %260 {offsets = [0, 32], sizes = [2, 32], strides = [1, 1]} : vector<2x64xf32> to vector<2x32xf32>
      %263 = vector.extract_strided_slice %254 {offsets = [0, 64], sizes = [2, 32], strides = [1, 1]} : vector<2x128xf32> to vector<2x32xf32>
      %264 = math.tanh %263 : vector<2x32xf32>
      %265 = vector.extract_strided_slice %254 {offsets = [0, 96], sizes = [2, 32], strides = [1, 1]} : vector<2x128xf32> to vector<2x32xf32>
      %266 = arith.negf %265 : vector<2x32xf32>
      %267 = math.exp %266 : vector<2x32xf32>
      %cst_63 = arith.constant 1.000000e+00 : f32
      %268 = vector.broadcast %cst_63 : f32 to vector<2x32xf32>
      %269 = arith.addf %268, %267 : vector<2x32xf32>
      %270 = arith.divf %268, %269 : vector<2x32xf32>
      %271 = arith.mulf %262, %248 : vector<2x32xf32>
      %272 = arith.mulf %261, %264 : vector<2x32xf32>
      %273 = arith.addf %271, %272 : vector<2x32xf32>
      %274 = math.tanh %273 : vector<2x32xf32>
      %275 = arith.mulf %270, %274 : vector<2x32xf32>
      %276 = arith.addi %3, %c6_i32 : i32
      %277 = vector.broadcast %276 : i32 to vector<2x1xi32>
      %278 = arith.cmpi slt, %277, %29 : vector<2x1xi32>
      %279 = vector.shape_cast %278 : vector<2x1xi1> to vector<2x1xi1>
      %280 = vector.broadcast %279 : vector<2x1xi1> to vector<2x32xi1>
      %281 = arith.select %280, %275, %245 : vector<2x32xi1>, vector<2x32xf32>
      %282 = vector.shape_cast %278 : vector<2x1xi1> to vector<2x1xi1>
      %283 = vector.broadcast %282 : vector<2x1xi1> to vector<2x32xi1>
      %284 = arith.select %283, %273, %248 : vector<2x32xi1>, vector<2x32xf32>
      %c7_i32 = arith.constant 7 : i32
      %285 = arith.index_cast %c7_i32 : i32 to index
      %c0_64 = arith.constant 0 : index
      %c0_65 = arith.constant 0 : index
      %286 = vector.load %arg12[%285, %c0_64, %c0_65] : memref<8x2x128xf32, #tpu.memory_space<vmem>>, vector<1x2x128xf32>
      %287 = vector.shape_cast %286 : vector<1x2x128xf32> to vector<2x128xf32>
      %288 = arith.truncf %281 : vector<2x32xf32> to vector<2x32xbf16>
      %cst_66 = arith.constant dense<0.000000e+00> : vector<2x128xf32>
      %289 = tpu.matmul %288, %30, %cst_66 {dimension_numbers = #tpu.dot_dimension_numbers<[1], [0], [0], [1], [0, 0, 1, 1], [], []>} : vector<2x32xbf16>, vector<32x128xbf16>, vector<2x128xf32> -> vector<2x128xf32>
      %290 = arith.addf %287, %289 : vector<2x128xf32>
      %291 = vector.extract_strided_slice %290 {offsets = [0, 0], sizes = [2, 64], strides = [1, 1]} : vector<2x128xf32> to vector<2x64xf32>
      %292 = arith.negf %291 : vector<2x64xf32>
      %293 = math.exp %292 : vector<2x64xf32>
      %cst_67 = arith.constant 1.000000e+00 : f32
      %294 = vector.broadcast %cst_67 : f32 to vector<2x64xf32>
      %295 = arith.addf %294, %293 : vector<2x64xf32>
      %296 = arith.divf %294, %295 : vector<2x64xf32>
      %297 = vector.extract_strided_slice %296 {offsets = [0, 0], sizes = [2, 32], strides = [1, 1]} : vector<2x64xf32> to vector<2x32xf32>
      %298 = vector.extract_strided_slice %296 {offsets = [0, 32], sizes = [2, 32], strides = [1, 1]} : vector<2x64xf32> to vector<2x32xf32>
      %299 = vector.extract_strided_slice %290 {offsets = [0, 64], sizes = [2, 32], strides = [1, 1]} : vector<2x128xf32> to vector<2x32xf32>
      %300 = math.tanh %299 : vector<2x32xf32>
      %301 = vector.extract_strided_slice %290 {offsets = [0, 96], sizes = [2, 32], strides = [1, 1]} : vector<2x128xf32> to vector<2x32xf32>
      %302 = arith.negf %301 : vector<2x32xf32>
      %303 = math.exp %302 : vector<2x32xf32>
      %cst_68 = arith.constant 1.000000e+00 : f32
      %304 = vector.broadcast %cst_68 : f32 to vector<2x32xf32>
      %305 = arith.addf %304, %303 : vector<2x32xf32>
      %306 = arith.divf %304, %305 : vector<2x32xf32>
      %307 = arith.mulf %298, %284 : vector<2x32xf32>
      %308 = arith.mulf %297, %300 : vector<2x32xf32>
      %309 = arith.addf %307, %308 : vector<2x32xf32>
      %310 = math.tanh %309 : vector<2x32xf32>
      %311 = arith.mulf %306, %310 : vector<2x32xf32>
      %312 = arith.addi %3, %c7_i32 : i32
      %313 = vector.broadcast %312 : i32 to vector<2x1xi32>
      %314 = arith.cmpi slt, %313, %29 : vector<2x1xi32>
      %315 = vector.shape_cast %314 : vector<2x1xi1> to vector<2x1xi1>
      %316 = vector.broadcast %315 : vector<2x1xi1> to vector<2x32xi1>
      %317 = arith.select %316, %311, %281 : vector<2x32xi1>, vector<2x32xf32>
      %318 = vector.shape_cast %314 : vector<2x1xi1> to vector<2x1xi1>
      %319 = vector.broadcast %318 : vector<2x1xi1> to vector<2x32xi1>
      %320 = arith.select %319, %309, %284 : vector<2x32xi1>, vector<2x32xf32>
      %c8_i32_69 = arith.constant 8 : i32
      %c0_70 = arith.constant 0 : index
      %c0_71 = arith.constant 0 : index
      %321 = vector.load %arg10[%c0_70, %c0_71] : memref<2x32xf32, #tpu.memory_space<vmem>>, vector<2x32xf32>
      tpu.vector_store %arg10[%c0_70, %c0_71], %317 {strides = array<i32>} : memref<2x32xf32, #tpu.memory_space<vmem>>, vector<2x32xf32>,
      %c0_72 = arith.constant 0 : index
      %c0_73 = arith.constant 0 : index
      %322 = vector.load %arg11[%c0_72, %c0_73] : memref<2x32xf32, #tpu.memory_space<vmem>>, vector<2x32xf32>
      tpu.vector_store %arg11[%c0_72, %c0_73], %320 {strides = array<i32>} : memref<2x32xf32, #tpu.memory_space<vmem>>, vector<2x32xf32>,
    } else {
    }
    %c0_i32_2 = arith.constant 0 : i32
    %8 = arith.cmpi eq, %arg0, %c0_i32_2 : i32
    %9 = arith.extui %8 : i1 to i32
    %c0_i32_3 = arith.constant 0 : i32
    %10 = arith.cmpi ne, %9, %c0_i32_3 : i32
    scf.if %10 {
      %c0_4 = arith.constant 0 : index
      %c0_5 = arith.constant 0 : index
      %11 = vector.load %arg10[%c0_4, %c0_5] : memref<2x32xf32, #tpu.memory_space<vmem>>, vector<2x32xf32>
      %12 = arith.truncf %11 : vector<2x32xf32> to vector<2x32xbf16>
      %c0_6 = arith.constant 0 : index
      %c0_7 = arith.constant 0 : index
      %13 = vector.load %arg7[%c0_6, %c0_7] : memref<32x5xbf16, #tpu.memory_space<vmem>>, vector<32x5xbf16>
      %cst = arith.constant dense<0.000000e+00> : vector<2x5xf32>
      %14 = tpu.matmul %12, %13, %cst {dimension_numbers = #tpu.dot_dimension_numbers<[1], [0], [0], [1], [0, 0, 1, 1], [], []>} : vector<2x32xbf16>, vector<32x5xbf16>, vector<2x5xf32> -> vector<2x5xf32>
      %c0_8 = arith.constant 0 : index
      %c0_9 = arith.constant 0 : index
      %15 = vector.load %arg8[%c0_8, %c0_9] : memref<1x5xf32, #tpu.memory_space<vmem>>, vector<1x5xf32>
      %16 = vector.broadcast %15 : vector<1x5xf32> to vector<2x5xf32>
      %17 = arith.addf %14, %16 : vector<2x5xf32>
      %c0_10 = arith.constant 0 : index
      %c0_11 = arith.constant 0 : index
      %18 = vector.load %arg9[%c0_10, %c0_11] : memref<2x5xf32, #tpu.memory_space<vmem>>, vector<2x5xf32>
      tpu.vector_store %arg9[%c0_10, %c0_11], %17 {strides = array<i32>} : memref<2x5xf32, #tpu.memory_space<vmem>>, vector<2x5xf32>,
    } else {
    }
    return
  }
  func.func @transform_0(%arg0: i32, %arg1: memref<1xi32, #tpu.memory_space<smem>>) -> (i32, i32) {
    %c0_i32 = arith.constant 0 : i32
    %c0_i32_0 = arith.constant 0 : i32
    %c0_i32_1 = arith.constant 0 : i32
    return %c0_i32, %c0_i32_0 : i32, i32
  }
  func.func @transform_1(%arg0: i32, %arg1: memref<1xi32, #tpu.memory_space<smem>>) -> (i32, i32, i32) {
    %c0_i32 = arith.constant 0 : i32
    %c0_i32_0 = arith.constant 0 : i32
    %c0_i32_1 = arith.constant 0 : i32
    return %c0_i32, %arg0, %c0_i32_0 : i32, i32, i32
  }
  func.func @transform_2(%arg0: i32, %arg1: memref<1xi32, #tpu.memory_space<smem>>) -> (i32, i32) {
    %c0_i32 = arith.constant 0 : i32
    %c0_i32_0 = arith.constant 0 : i32
    %c0_i32_1 = arith.constant 0 : i32
    return %c0_i32, %c0_i32_0 : i32, i32
  }
  func.func @transform_3(%arg0: i32, %arg1: memref<1xi32, #tpu.memory_space<smem>>) -> (i32, i32) {
    %c0_i32 = arith.constant 0 : i32
    %c0_i32_0 = arith.constant 0 : i32
    %c0_i32_1 = arith.constant 0 : i32
    return %c0_i32, %c0_i32_0 : i32, i32
  }
  func.func @transform_4(%arg0: i32, %arg1: memref<1xi32, #tpu.memory_space<smem>>) -> (i32, i32) {
    %c0_i32 = arith.constant 0 : i32
    %c0_i32_0 = arith.constant 0 : i32
    %c0_i32_1 = arith.constant 0 : i32
    return %c0_i32, %c0_i32_0 : i32, i32
  }
  func.func @transform_5(%arg0: i32, %arg1: memref<1xi32, #tpu.memory_space<smem>>) -> (i32, i32) {
    %c0_i32 = arith.constant 0 : i32
    %c0_i32_0 = arith.constant 0 : i32
    %c0_i32_1 = arith.constant 0 : i32
    return %c0_i32, %c0_i32_0 : i32, i32
  }
  func.func @transform_6(%arg0: i32, %arg1: memref<1xi32, #tpu.memory_space<smem>>) -> (i32, i32) {
    %c0_i32 = arith.constant 0 : i32
    %c0_i32_0 = arith.constant 0 : i32
    %c0_i32_1 = arith.constant 0 : i32
    return %c0_i32, %c0_i32_0 : i32, i32
  }
  func.func @transform_7(%arg0: i32, %arg1: memref<1xi32, #tpu.memory_space<smem>>) -> (i32, i32) {
    %c0_i32 = arith.constant 0 : i32
    %c0_i32_0 = arith.constant 0 : i32
    %c0_i32_1 = arith.constant 0 : i32
    return %c0_i32, %c0_i32_0 : i32, i32
  }
}

</mosaic_0001>

<bundles_post_ra>
// kernel: tpu_custom_call.1
= control target key start
LH: loop header
LB: loop body
LE: loop exit
PB: predicated region body
PF: predicated region fallthrough
CT: control target
= control target key end

     0   :  { %14 = vsyncpa [#allocation8], 0  ;;  %s1614_s0 = inlined_call_operand.<no memory space> [shape: s32[1], index: 0, kind: input, shape index: {}]   ;;  %s1615_s1 = inlined_call_operand.vmem [shape: s32[2,1], index: 1, kind: input, shape index: {}]   ;;  %s1616_s2 = inlined_call_operand.vmem [shape: bf16[2,8,16], index: 2, kind: input, shape index: {}]   ;;  %s1617_s3 = inlined_call_operand.vmem [shape: bf16[16,128], index: 3, kind: input, shape index: {}]   ;;  %s1618_s4 = inlined_call_operand.hbm [shape: f32[1,128], index: 4, kind: input, shape index: {}]   ;;  %s1619_s5 = inlined_call_operand.vmem [shape: bf16[32,128], index: 5, kind: input, shape index: {}]   ;;  %s1620_s6 = inlined_call_operand.vmem [shape: bf16[32,5], index: 6, kind: input, shape index: {}]   ;;  %s1621_s7 = inlined_call_operand.vmem [shape: f32[1,5], index: 7, kind: input, shape index: {}]   ;;  %s1622_s8 = inlined_call_operand.hbm [shape: f32[2,5], index: 8, kind: output, shape index: {}]  }
   0x1   :  { %15 = vsyncpa [#allocation9], 0  ;;  %s1373_s27 = smov [#allocation7]  }
   0x2   :  { %s28_s28 = sshll.u32 %s1373_s27, 4  ;;  %s29_s28 = int_to_ptr.vmem [resolvable:$true] %s28_s28 }
   0x3   :  { %s1337_s29 = scalar_lea.vmem %s29_s28, 16  ;;  %s1341_s30 = scalar_lea.vmem %s29_s28, 32 }
   0x4   :  { %p1338_p0 = scmp.ne.s32.totalorder %s29_s28, %s1337_s29  ;;  %p1342_p1 = scmp.lt.s32.totalorder %s29_s28, %s29_s28 }
   0x5   :  { %p1343_p2 = scmp.lt.s32.totalorder %s1341_s30, %s1337_s29 }
   0x7   :  { %p1344_p3 = por %p1343_p2, %p1342_p1 }
   0x9   :  { %p1345_p4 = pnand %p1344_p3, %p1338_p0 }
   0xb   :  { %1348 = shalt.err (!%p1345_p4)
}
   0xc   :  { %31 = dma.hbm_to_vmem [thread:$0]  %s1618_s4, 16, %s29_s28, [#allocation8]  }
   0xd   :  { %1369 = dma.done.wait [#allocation8], 16  }
   0xe   :  { %1370 = vsyncadd [#allocation8], 4294967280  ;;  %vm46_vm0 = vcmask 254976   ;;  %v1374_v0 = vmov 0.0   ;;  %p1088_p5 = scmp.le.s32.totalorder %s1614_s0, 0 }
   0xf   :  { %47 = vst.msk [vmem:[#allocation2] sm:$0x3] %vm46_vm0, %v1374_v0  ;;  %48 = vst.msk [vmem:[#allocation3] sm:$0x3] %vm46_vm0, %v1374_v0  ;;  %s1380_s19 = smov (!%p1088_p5), 32   ;;  %s1381_s22 = smov (!%p1088_p5), 96  }
  0x10   :  { %54 = sbr.rel (%p1088_p5) target bundleno = 5574 (0x15c6), region = 41 }
  0x15   :  { %v1260_v1 = vld [vmem:[%s1617_s3] sm:$0xff]   ;;  %v1375_v2 = vmov 0.0   ;;  %vm71_vm1 = vcmask 130048   ;;  %v1453_v5 = vld [vmem:[%s1619_s5 + $0x8] sm:$0xff]   ;;  %vm1376_vm2 = vmmov 0   ;;  %vm313_vm3 = vcmask 261120  }
  0x16   :  { %1163 = vmatprep.subr.bf16.mxu0 %v1375_v2  ;;  %1169 = vmatprep.subr.bf16.mxu1 %v1375_v2  ;;  %v58_v3 = vld [vmem:[%s1616_s2] sm:$0xf]  ;;  %v1096_v4 = vld [vmem:[%s1616_s2 + $0x4] sm:$0xf]  ;;  %v1377_v9 = vmov 1966171168   ;;  %v120_v11 = vlaneseq }
  0x17   :  { %1164 = vmatpush3.bf16.msra.mxu0 %v1260_v1  ;;  %1170 = vmatpush3.bf16.msra.mxu1 %v1260_v1  ;;  %v1465_v6 = vld [vmem:[%s1619_s5] sm:$0xff]   ;;  %v118_v10 = vunpack.c.l.s4 %v1377_v9  ;;  %v1089_v14 = vld [vmem:[#allocation7] ss:$0 sm:$0xff]  ;;  %v1378_v58 = vmov 0   ;;  %s1379_s5 = smov 64  }
  0x18   :  { %1165 = vmatprep.mubr.msk.bf16.mxu0 %vm1376_vm2, %v1375_v2  ;;  %1171 = vmatprep.mubr.msk.bf16.mxu1 %vm1376_vm2, %v1375_v2  ;;  %v1469_v7 = vld [vmem:[#allocation2] sm:$0x3]  ;;  %v121_v13 = vshrl.u32 %v120_v11, 7  ;;  %v298_v60 = vld [vmem:[#allocation3] sm:$0x3] }
  0x19   :  { %1175 = vmatprep.subr.bf16.mxu0 %v1375_v2  ;;  %1183 = vmatprep.subr.bf16.mxu1 %v1375_v2  ;;  %v300_v8 = vpack.c.bf16 %v1469_v7, %v1469_v7  ;;  %v119_v12 = vunpack.c.0.s8 %v118_v10  ;;  %v1496_v1 = vld [vmem:[%s1615_s1] sm:$0x3] }
  0x1a   :  { %1166 = vmatmul.mubr.msk.bf16.vlgmr.msra.gmra.mxu0 %vm71_vm1, %v58_v3  ;;  %1172 = vmatmul.mubr.msk.bf16.vlgmr.msra.gmra.mxu1 %vm71_vm1, %v1096_v4  ;;  %vm1106_vm4 = vcmp.gt.s32.totalorder %v1496_v1, 0  ;;  %vm1109_vm6 = vcmp.gt.s32.totalorder %v1496_v1, 1  ;;  %vm1112_vm8 = vcmp.gt.s32.totalorder %v1496_v1, 2  ;;  %vm1115_vm10 = vcmp.gt.s32.totalorder %v1496_v1, 3 }
  0x1b   :  { %1176 = vmatpush3.bf16.msra.mxu0 %v1453_v5  ;;  %1179 = vmatprep.mubr.msk.bf16.mxu0 %vm1376_vm2, %v1375_v2  ;;  %v122_v15 = vsub.s32 %v119_v12, %v121_v13  ;;  %v388_v9 = vsel %vm1106_vm4, 1, %v1378_v58  ;;  %vm1118_vm12 = vcmp.gt.s32.totalorder %v1496_v1, 4  ;;  %vm1121_vm14 = vcmp.gt.s32.totalorder %v1496_v1, 5 }
  0x1c   :  { %1177 = vmatprep.subr.bf16.mxu0 %v1375_v2  ;;  %1184 = vmatpush3.bf16.msra.mxu1 %v1453_v5  ;;  %vm1124_vm1 = vcmp.gt.s32.totalorder %v1496_v1, 6  ;;  %vm1127_vm4 = vcmp.gt.s32.totalorder %v1496_v1, 7 }
  0x1d   :  { %1185 = vmatprep.subr.bf16.mxu1 %v1375_v2  ;;  %1187 = vmatprep.mubr.msk.bf16.mxu1 %vm1376_vm2, %v1375_v2 }
  0x1e   :  { %1258 = vset.pattern.permute.xlu1 %v1378_v58  ;;  %1259 = vset.pattern.permute.xlu0 %v1378_v58 }
  0x1f   :  { %1178 = vmatpush3.bf16.msra.mxu0 %v1465_v6 }
  0x20   :  { %1186 = vmatpush3.bf16.msra.mxu1 %v1465_v6  ;;  %1191 = vmatprep.subr.bf16.mxu0 %v1375_v2 }
  0x21   :  { %1199 = vmatprep.subr.bf16.mxu1 %v1375_v2 }
  0x22   :  { %1180 = vmatmul.mubr.msk.bf16.vlgmr.msra.gmra.mxu0 %vm313_vm3, %v300_v8 }
  0x23   :  { %1192 = vmatpush3.bf16.msra.mxu0 %v1453_v5  ;;  %1195 = vmatprep.mubr.msk.bf16.mxu0 %vm1376_vm2, %v1375_v2 }
  0x24   :  { %1193 = vmatprep.subr.bf16.mxu0 %v1375_v2 }
  0x27   :  { %1194 = vmatpush3.bf16.msra.mxu0 %v1465_v6 }
  0x28   :  { %1207 = vmatprep.subr.bf16.mxu0 %v1375_v2 }
  0xda   :  { %v109_v16 = vpop.f32.mrf.mxu0  ;;  %v220_v17 = vpop.f32.mrf.mxu1 }
  0xdb   :  { %v110_v18 = vadd.f32 %v1089_v14, %v109_v16  ;;  %v221_v19 = vadd.f32 %v1089_v14, %v220_v17 }
  0xdc   :  { %v1167_v20 = vpop.f32.mrf.mxu0  ;;  %v1173_v21 = vpop.f32.mrf.mxu1 }
  0xdd   :  { %v116_v22 = vcombine.high %v110_v18, %v110_v18  ;;  %v123_v23 = vrot.slane %v110_v18, %v122_v15  ;;  %v227_v24 = vcombine.high %v221_v19, %v221_v19  ;;  %v234_v25 = vrot.slane %v221_v19, %v122_v15 }
  0xde   :  { %v112_v26 = vpop.f32.mrf.mxu0  ;;  %v223_v27 = vpop.f32.mrf.mxu1 }
  0xdf   :  { %v130_v28 = vrot.slane %v116_v22, %v122_v15  ;;  %v131_v29 = vcombine.high %v123_v23, %v123_v23  ;;  %v139_v30 = vrot.slane %v123_v23, %v122_v15  ;;  %1092 = vst.sshfl [vmem:[#allocation4] sm:$0x1 pattern:$0x73625140] %v123_v23  ;;  %v241_v31 = vrot.slane %v227_v24, %v122_v15 }
  0xe0   :  { %1098 = vst.sshfl [vmem:[#allocation4 + $0x1] sm:$0x1 pattern:$0x73625140] %v234_v25  ;;  %v242_v32 = vcombine.high %v234_v25, %v234_v25  ;;  %v250_v33 = vrot.slane %v234_v25, %v122_v15  ;;  %v1168_v34 = vpop.f32.mrf.mxu0  ;;  %v1174_v35 = vpop.f32.mrf.mxu1 }
  0xe1   :  { %v132_v36 = vcombine.high %v130_v28, %v130_v28  ;;  %v146_v37 = vrot.slane %v130_v28, %v122_v15  ;;  %v153_v38 = vrot.slane %v131_v29, %v122_v15  ;;  %v161_v39 = vcombine.high %v139_v30, %v139_v30  ;;  %1093 = vst.sshfl [vmem:[#allocation4 + $0x2] sm:$0x1 pattern:$0x73625140] %v131_v29 }
  0xe2   :  { %1094 = vst.sshfl [vmem:[#allocation4 + $0x8] sm:$0x1 pattern:$0x73625140] %v130_v28  ;;  %v243_v40 = vcombine.high %v241_v31, %v241_v31  ;;  %v257_v41 = vrot.slane %v241_v31, %v122_v15  ;;  %v264_v42 = vrot.slane %v242_v32, %v122_v15  ;;  %v272_v43 = vcombine.high %v250_v33, %v250_v33  ;;  %v351_v44 = vpop.f32.mrf.mxu0 }
  0xe3   :  { %1100 = vst.sshfl [vmem:[#allocation4 + $0x9] sm:$0x1 pattern:$0x73625140] %v241_v31  ;;  %v160_v45 = vrot.slane %v132_v36, %v122_v15  ;;  %v162_v46 = vcombine.high %v146_v37, %v146_v37  ;;  %v163_v47 = vcombine.high %v153_v38, %v153_v38  ;;  %175 = vst [vmem:[#allocation4 + $0x4] sm:$0x1] %v161_v39 }
  0xe4   :  { %1099 = vst.sshfl [vmem:[#allocation4 + $0x3] sm:$0x1 pattern:$0x73625140] %v242_v32  ;;  %v271_v48 = vrot.slane %v243_v40, %v122_v15  ;;  %v273_v49 = vcombine.high %v257_v41, %v257_v41  ;;  %v274_v50 = vcombine.high %v264_v42, %v264_v42  ;;  %286 = vst [vmem:[#allocation4 + $0x5] sm:$0x1] %v272_v43  ;;  %v1181_v51 = vpop.f32.mrf.mxu0 }
  0xe5   :  { %1095 = vst.sshfl [vmem:[#allocation4 + $0xa] sm:$0x1 pattern:$0x73625140] %v132_v36  ;;  %v164_v52 = vcombine.high %v160_v45, %v160_v45  ;;  %176 = vst [vmem:[#allocation4 + $0x6] sm:$0x1] %v163_v47 }
  0xe6   :  { %1101 = vst.sshfl [vmem:[#allocation4 + $0xb] sm:$0x1 pattern:$0x73625140] %v243_v40  ;;  %179 = vst [vmem:[#allocation4 + $0xc] sm:$0x1] %v162_v46  ;;  %v275_v53 = vcombine.high %v271_v48, %v271_v48  ;;  %v354_v55 = vpop.f32.mrf.mxu0 }
  0xe7   :  { %287 = vst [vmem:[#allocation4 + $0x7] sm:$0x1] %v274_v50  ;;  %290 = vst [vmem:[#allocation4 + $0xd] sm:$0x1] %v273_v49  ;;  %v299_v54 = vld [vmem:[#allocation4] sm:$0x3] }
  0xe8   :  { %180 = vst [vmem:[#allocation4 + $0xe] sm:$0x1] %v164_v52  ;;  %v357_v56 = vadd.f32 %v351_v44, %v299_v54  ;;  %291 = vst [vmem:[#allocation4 + $0xf] sm:$0x1] %v275_v53  ;;  %v1182_v57 = vpop.f32.mrf.mxu0  ;;  %v476_v28 = vsel %vm1109_vm6, 1, %v1378_v58  ;;  %v560_v53 = vsel %vm1112_vm8, 1, %v1378_v58 }
  0xea   :  { %1263 = vtanh.f32 %v357_v56  ;;  %v1105_v61 = vmul.f32 -1.442695, %v357_v56 }
  0xeb   :  { %v484_v46 = vld [vmem:[#allocation4 + $0x4] sm:$0x3] }
  0xec   :  { %1265 = vpow2.f32 %v1105_v61 }
  0xf7   :  { %v1264_v59 = vpop.eup %1263 }
  0xf8   :  { %371 = vrot.lane.b32.xlu0 %v1264_v59, %s1379_s5 }
  0xf9   :  { %v1266_v62 = vpop.eup %1265 }
  0xfa   :  { %v361_v63 = vadd.f32 1.0, %v1266_v62 }
  0xfc   :  { %366 = vrot.lane.b32.xlu0 %v298_v60, %s1380_s19  ;;  %1267 = vrcp.f32 %v361_v63 }
 0x109   :  { %v1268_v3 = vpop.eup %1267 }
 0x16a   :  { %v372_v4 = vpop.permute.xlu0 %371 }
 0x16b   :  { %v374_v8 = vmul.f32 %v1268_v3, %v372_v4 }
 0x16d   :  { %376 = vrot.lane.b32.xlu1 %v374_v8, %s1380_s19 }
 0x16e   :  { %v367_v10 = vpop.permute.xlu0 %366 }
 0x16f   :  { %v369_v11 = vmul.f32 %v1268_v3, %v367_v10 }
 0x171   :  { %390 = vperm.xlu1 %1258, %v388_v9  }
 0x175   :  { %394 = vrot.lane.b32.xlu1 %v1469_v7, %s1381_s22  ;;  %v400_v7 = vld [vmem:[#allocation4 + $0x2] sm:$0x3] }
 0x1df   :  { %v377_v12 = vpop.permute.xlu1 %376 }
 0x1e0   :  { %v379_v13 = vadd.f32 %v377_v12, %v369_v11 }
 0x1e2   :  { %1269 = vtanh.f32 %v379_v13 }
 0x1ec   :  { %v391_v15 = vpop.permute.xlu1 %390 }
 0x1ed   :  { %vm392_vm5 = vcmp.eq.s32.totalorder %v391_v15, 1 }
 0x1ee   :  { %v398_v35 = vsel %vm392_vm5, %v379_v13, %v367_v10 }
 0x1ef   :  { %v1270_v14 = vpop.eup %1269 }
 0x1f0   :  { %382 = vrot.lane.b32.xlu0 %v1270_v14, %s1379_s5  ;;  %v395_v17 = vpop.permute.xlu1 %394  ;;  %v568_v14 = vld [vmem:[#allocation4 + $0x6] sm:$0x3] }
 0x262   :  { %v383_v16 = vpop.permute.xlu0 %382 }
 0x263   :  { %v385_v18 = vmul.f32 %v1268_v3, %v383_v16 }
 0x265   :  { %v397_v19 = vsel %vm392_vm5, %v385_v18, %v395_v17 }
 0x266   :  { %v401_v20 = vpack.c.bf16 %v397_v19, %v397_v19 }
 0x268   :  { %403 = vrot.lane.b32.xlu0 %v401_v20, %s1380_s19 }
 0x2da   :  { %v404_v21 = vpop.permute.xlu0 %403 }
 0x2db   :  { %1188 = vmatmul.mubr.msk.bf16.vlgmr.msra.gmra.mxu1 %vm313_vm3, %v404_v21  ;;  %v644_v21 = vsel %vm1115_vm10, 1, %v1378_v58 }
 0x2dc   :  { %1200 = vmatpush3.bf16.msra.mxu1 %v1453_v5  ;;  %1203 = vmatprep.mubr.msk.bf16.mxu1 %vm1376_vm2, %v1375_v2 }
 0x2dd   :  { %1201 = vmatprep.subr.bf16.mxu1 %v1375_v2 }
 0x2e0   :  { %1202 = vmatpush3.bf16.msra.mxu1 %v1465_v6 }
 0x2e1   :  { %1215 = vmatprep.subr.bf16.mxu1 %v1375_v2 }
 0x39b   :  { %v442_v22 = vpop.f32.mrf.mxu1 }
 0x39c   :  { %v448_v23 = vadd.f32 %v442_v22, %v400_v7 }
 0x39d   :  { %v1189_v24 = vpop.f32.mrf.mxu1 }
 0x39e   :  { %1271 = vtanh.f32 %v448_v23  ;;  %v1108_v29 = vmul.f32 -1.442695, %v448_v23 }
 0x39f   :  { %v445_v25 = vpop.f32.mrf.mxu1 }
 0x3a0   :  { %1273 = vpow2.f32 %v1108_v29 }
 0x3a1   :  { %v1190_v26 = vpop.f32.mrf.mxu1 }
 0x3ab   :  { %v1272_v27 = vpop.eup %1271 }
 0x3ac   :  { %458 = vrot.lane.b32.xlu1 %v1272_v27, %s1379_s5 }
 0x3ad   :  { %v1274_v30 = vpop.eup %1273 }
 0x3ae   :  { %v452_v31 = vadd.f32 1.0, %v1274_v30 }
 0x3b0   :  { %478 = vperm.xlu1 %1258, %v476_v28   ;;  %1275 = vrcp.f32 %v452_v31 }
 0x3bd   :  { %v1276_v32 = vpop.eup %1275 }
 0x3be   :  { %v456_v36 = vmul.f32 %v1276_v32, %v398_v35 }
 0x41e   :  { %v459_v33 = vpop.permute.xlu1 %458 }
 0x41f   :  { %v461_v34 = vmul.f32 %v1276_v32, %v459_v33 }
 0x421   :  { %463 = vrot.lane.b32.xlu0 %v461_v34, %s1380_s19 }
 0x42b   :  { %v479_v40 = vpop.permute.xlu1 %478 }
 0x42c   :  { %vm480_vm7 = vcmp.eq.s32.totalorder %v479_v40, 1 }
 0x493   :  { %v464_v37 = vpop.permute.xlu0 %463 }
 0x494   :  { %v466_v38 = vadd.f32 %v464_v37, %v456_v36 }
 0x496   :  { %1277 = vtanh.f32 %v466_v38  ;;  %v482_v61 = vsel %vm480_vm7, %v466_v38, %v398_v35  ;;  %v652_v38 = vld [vmem:[#allocation4 + $0x8] sm:$0x3] }
 0x4a3   :  { %v1278_v39 = vpop.eup %1277 }
 0x4a4   :  { %469 = vrot.lane.b32.xlu0 %v1278_v39, %s1379_s5 }
 0x516   :  { %v470_v41 = vpop.permute.xlu0 %469 }
 0x517   :  { %v472_v42 = vmul.f32 %v1276_v32, %v470_v41 }
 0x519   :  { %v481_v43 = vsel %vm480_vm7, %v472_v42, %v397_v19 }
 0x51a   :  { %v485_v44 = vpack.c.bf16 %v481_v43, %v481_v43 }
 0x51c   :  { %487 = vrot.lane.b32.xlu1 %v485_v44, %s1380_s19 }
 0x58e   :  { %v488_v45 = vpop.permute.xlu1 %487 }
 0x58f   :  { %1196 = vmatmul.mubr.msk.bf16.vlgmr.msra.gmra.mxu0 %vm313_vm3, %v488_v45  ;;  %v728_v45 = vsel %vm1118_vm12, 1, %v1378_v58 }
 0x590   :  { %1208 = vmatpush3.bf16.msra.mxu0 %v1453_v5  ;;  %1211 = vmatprep.mubr.msk.bf16.mxu0 %vm1376_vm2, %v1375_v2 }
 0x591   :  { %1209 = vmatprep.subr.bf16.mxu0 %v1375_v2 }
 0x594   :  { %1210 = vmatpush3.bf16.msra.mxu0 %v1465_v6 }
 0x595   :  { %1223 = vmatprep.subr.bf16.mxu0 %v1375_v2 }
 0x64f   :  { %v526_v47 = vpop.f32.mrf.mxu0 }
 0x650   :  { %v532_v48 = vadd.f32 %v526_v47, %v484_v46 }
 0x651   :  { %v1197_v49 = vpop.f32.mrf.mxu0 }
 0x652   :  { %1279 = vtanh.f32 %v532_v48  ;;  %v1111_v54 = vmul.f32 -1.442695, %v532_v48 }
 0x653   :  { %v529_v50 = vpop.f32.mrf.mxu0 }
 0x654   :  { %1281 = vpow2.f32 %v1111_v54 }
 0x655   :  { %v1198_v51 = vpop.f32.mrf.mxu0 }
 0x65f   :  { %v1280_v52 = vpop.eup %1279 }
 0x660   :  { %542 = vrot.lane.b32.xlu0 %v1280_v52, %s1379_s5 }
 0x661   :  { %v1282_v55 = vpop.eup %1281 }
 0x662   :  { %v536_v56 = vadd.f32 1.0, %v1282_v55 }
 0x664   :  { %562 = vperm.xlu0 %1259, %v560_v53   ;;  %1283 = vrcp.f32 %v536_v56 }
 0x671   :  { %v1284_v57 = vpop.eup %1283 }
 0x672   :  { %v540_v62 = vmul.f32 %v1284_v57, %v482_v61 }
 0x6d2   :  { %v543_v59 = vpop.permute.xlu0 %542 }
 0x6d3   :  { %v545_v60 = vmul.f32 %v1284_v57, %v543_v59 }
 0x6d5   :  { %547 = vrot.lane.b32.xlu1 %v545_v60, %s1380_s19 }
 0x6df   :  { %v563_v8 = vpop.permute.xlu0 %562 }
 0x6e0   :  { %vm564_vm9 = vcmp.eq.s32.totalorder %v563_v8, 1 }
 0x747   :  { %v548_v63 = vpop.permute.xlu1 %547 }
 0x748   :  { %v550_v3 = vadd.f32 %v548_v63, %v540_v62 }
 0x74a   :  { %1285 = vtanh.f32 %v550_v3  ;;  %v566_v27 = vsel %vm564_vm9, %v550_v3, %v482_v61  ;;  %v736_v3 = vld [vmem:[#allocation4 + $0xa] sm:$0x3] }
 0x757   :  { %v1286_v4 = vpop.eup %1285 }
 0x758   :  { %553 = vrot.lane.b32.xlu1 %v1286_v4, %s1379_s5 }
 0x7ca   :  { %v554_v9 = vpop.permute.xlu1 %553 }
 0x7cb   :  { %v556_v10 = vmul.f32 %v1284_v57, %v554_v9 }
 0x7cd   :  { %v565_v11 = vsel %vm564_vm9, %v556_v10, %v481_v43 }
 0x7ce   :  { %v569_v12 = vpack.c.bf16 %v565_v11, %v565_v11 }
 0x7d0   :  { %571 = vrot.lane.b32.xlu1 %v569_v12, %s1380_s19 }
 0x842   :  { %v572_v13 = vpop.permute.xlu1 %571 }
 0x843   :  { %1204 = vmatmul.mubr.msk.bf16.vlgmr.msra.gmra.mxu1 %vm313_vm3, %v572_v13 }
 0x844   :  { %1216 = vmatpush3.bf16.msra.mxu1 %v1453_v5  ;;  %1219 = vmatprep.mubr.msk.bf16.mxu1 %vm1376_vm2, %v1375_v2 }
 0x845   :  { %1217 = vmatprep.subr.bf16.mxu1 %v1375_v2 }
 0x848   :  { %1218 = vmatpush3.bf16.msra.mxu1 %v1465_v6 }
 0x849   :  { %1231 = vmatprep.subr.bf16.mxu1 %v1375_v2 }
 0x903   :  { %v610_v15 = vpop.f32.mrf.mxu1 }
 0x904   :  { %v616_v16 = vadd.f32 %v610_v15, %v568_v14 }
 0x905   :  { %v1205_v17 = vpop.f32.mrf.mxu1 }
 0x906   :  { %1287 = vtanh.f32 %v616_v16  ;;  %v1114_v7 = vmul.f32 -1.442695, %v616_v16 }
 0x907   :  { %v613_v18 = vpop.f32.mrf.mxu1 }
 0x908   :  { %1289 = vpow2.f32 %v1114_v7 }
 0x909   :  { %v1206_v19 = vpop.f32.mrf.mxu1 }
 0x913   :  { %v1288_v20 = vpop.eup %1287 }
 0x914   :  { %626 = vrot.lane.b32.xlu0 %v1288_v20, %s1379_s5 }
 0x915   :  { %v1290_v22 = vpop.eup %1289 }
 0x916   :  { %v620_v23 = vadd.f32 1.0, %v1290_v22 }
 0x918   :  { %646 = vperm.xlu0 %1259, %v644_v21   ;;  %1291 = vrcp.f32 %v620_v23 }
 0x925   :  { %v1292_v24 = vpop.eup %1291 }
 0x926   :  { %v624_v28 = vmul.f32 %v1292_v24, %v566_v27 }
 0x986   :  { %v627_v25 = vpop.permute.xlu0 %626 }
 0x987   :  { %v629_v26 = vmul.f32 %v1292_v24, %v627_v25 }
 0x989   :  { %631 = vrot.lane.b32.xlu1 %v629_v26, %s1380_s19 }
 0x993   :  { %v647_v32 = vpop.permute.xlu0 %646 }
 0x994   :  { %vm648_vm11 = vcmp.eq.s32.totalorder %v647_v32, 1 }
 0x9fb   :  { %v632_v29 = vpop.permute.xlu1 %631 }
 0x9fc   :  { %v634_v30 = vadd.f32 %v632_v29, %v624_v28 }
 0x9fe   :  { %1293 = vtanh.f32 %v634_v30  ;;  %v650_v52 = vsel %vm648_vm11, %v634_v30, %v566_v27  ;;  %v820_v27 = vld [vmem:[#allocation4 + $0xc] sm:$0x3] }
 0xa0b   :  { %v1294_v31 = vpop.eup %1293 }
 0xa0c   :  { %637 = vrot.lane.b32.xlu1 %v1294_v31, %s1379_s5 }
 0xa7e   :  { %v638_v33 = vpop.permute.xlu1 %637 }
 0xa7f   :  { %v640_v34 = vmul.f32 %v1292_v24, %v638_v33 }
 0xa81   :  { %v649_v35 = vsel %vm648_vm11, %v640_v34, %v565_v11  ;;  %v896_v34 = vsel %vm1124_vm1, 1, %v1378_v58 }
 0xa82   :  { %v653_v36 = vpack.c.bf16 %v649_v35, %v649_v35 }
 0xa84   :  { %655 = vrot.lane.b32.xlu0 %v653_v36, %s1380_s19 }
 0xaf6   :  { %v656_v37 = vpop.permute.xlu0 %655 }
 0xaf7   :  { %1212 = vmatmul.mubr.msk.bf16.vlgmr.msra.gmra.mxu0 %vm313_vm3, %v656_v37 }
 0xaf8   :  { %1224 = vmatpush3.bf16.msra.mxu0 %v1453_v5  ;;  %1227 = vmatprep.mubr.msk.bf16.mxu0 %vm1376_vm2, %v1375_v2 }
 0xaf9   :  { %1225 = vmatprep.subr.bf16.mxu0 %v1375_v2 }
 0xafc   :  { %1226 = vmatpush3.bf16.msra.mxu0 %v1465_v6 }
 0xbb7   :  { %v694_v39 = vpop.f32.mrf.mxu0 }
 0xbb8   :  { %v700_v40 = vadd.f32 %v694_v39, %v652_v38 }
 0xbb9   :  { %v1213_v41 = vpop.f32.mrf.mxu0 }
 0xbba   :  { %1295 = vtanh.f32 %v700_v40  ;;  %v1117_v46 = vmul.f32 -1.442695, %v700_v40 }
 0xbbb   :  { %v697_v42 = vpop.f32.mrf.mxu0 }
 0xbbc   :  { %1297 = vpow2.f32 %v1117_v46 }
 0xbbd   :  { %v1214_v43 = vpop.f32.mrf.mxu0 }
 0xbc7   :  { %v1296_v44 = vpop.eup %1295 }
 0xbc8   :  { %710 = vrot.lane.b32.xlu1 %v1296_v44, %s1379_s5 }
 0xbc9   :  { %v1298_v47 = vpop.eup %1297 }
 0xbca   :  { %v704_v48 = vadd.f32 1.0, %v1298_v47 }
 0xbcc   :  { %730 = vperm.xlu1 %1258, %v728_v45   ;;  %1299 = vrcp.f32 %v704_v48 }
 0xbd9   :  { %v1300_v49 = vpop.eup %1299 }
 0xbda   :  { %v708_v53 = vmul.f32 %v1300_v49, %v650_v52 }
 0xc3a   :  { %v711_v50 = vpop.permute.xlu1 %710 }
 0xc3b   :  { %v713_v51 = vmul.f32 %v1300_v49, %v711_v50 }
 0xc3d   :  { %715 = vrot.lane.b32.xlu0 %v713_v51, %s1380_s19 }
 0xc47   :  { %v731_v57 = vpop.permute.xlu1 %730 }
 0xc48   :  { %vm732_vm13 = vcmp.eq.s32.totalorder %v731_v57, 1 }
 0xcaf   :  { %v716_v54 = vpop.permute.xlu0 %715 }
 0xcb0   :  { %v718_v55 = vadd.f32 %v716_v54, %v708_v53 }
 0xcb2   :  { %1301 = vtanh.f32 %v718_v55  ;;  %v734_v17 = vsel %vm732_vm13, %v718_v55, %v650_v52  ;;  %v904_v52 = vld [vmem:[#allocation4 + $0xe] sm:$0x3] }
 0xcbf   :  { %v1302_v56 = vpop.eup %1301 }
 0xcc0   :  { %721 = vrot.lane.b32.xlu0 %v1302_v56, %s1379_s5 }
 0xd32   :  { %v722_v59 = vpop.permute.xlu0 %721 }
 0xd33   :  { %v724_v60 = vmul.f32 %v1300_v49, %v722_v59 }
 0xd35   :  { %v733_v61 = vsel %vm732_vm13, %v724_v60, %v649_v35  ;;  %v980_v60 = vsel %vm1127_vm4, 1, %v1378_v58 }
 0xd36   :  { %v737_v62 = vpack.c.bf16 %v733_v61, %v733_v61 }
 0xd38   :  { %739 = vrot.lane.b32.xlu1 %v737_v62, %s1380_s19 }
 0xdaa   :  { %v740_v63 = vpop.permute.xlu1 %739 }
 0xdab   :  { %1220 = vmatmul.mubr.msk.bf16.vlgmr.msra.gmra.mxu1 %vm313_vm3, %v740_v63 }
 0xdac   :  { %1232 = vmatpush3.bf16.msra.mxu1 %v1453_v5  ;;  %1235 = vmatprep.mubr.msk.bf16.mxu1 %vm1376_vm2, %v1375_v2  ;;  %v812_v5 = vsel %vm1121_vm14, 1, %v1378_v58 }
 0xdad   :  { %1233 = vmatprep.subr.bf16.mxu1 %v1375_v2 }
 0xdb0   :  { %1234 = vmatpush3.bf16.msra.mxu1 %v1465_v6 }
 0xe6b   :  { %v778_v4 = vpop.f32.mrf.mxu1 }
 0xe6c   :  { %v784_v8 = vadd.f32 %v778_v4, %v736_v3 }
 0xe6d   :  { %v1221_v9 = vpop.f32.mrf.mxu1 }
 0xe6e   :  { %1303 = vtanh.f32 %v784_v8  ;;  %v1120_v13 = vmul.f32 -1.442695, %v784_v8 }
 0xe6f   :  { %v781_v10 = vpop.f32.mrf.mxu1 }
 0xe70   :  { %1305 = vpow2.f32 %v1120_v13 }
 0xe71   :  { %v1222_v11 = vpop.f32.mrf.mxu1 }
 0xe7b   :  { %v1304_v12 = vpop.eup %1303 }
 0xe7c   :  { %794 = vrot.lane.b32.xlu0 %v1304_v12, %s1379_s5 }
 0xe7d   :  { %v1306_v2 = vpop.eup %1305 }
 0xe7e   :  { %v788_v14 = vadd.f32 1.0, %v1306_v2 }
 0xe80   :  { %814 = vperm.xlu0 %1259, %v812_v5   ;;  %1307 = vrcp.f32 %v788_v14 }
 0xe8d   :  { %v1308_v6 = vpop.eup %1307 }
 0xe8e   :  { %v792_v18 = vmul.f32 %v1308_v6, %v734_v17 }
 0xeee   :  { %v795_v15 = vpop.permute.xlu0 %794 }
 0xeef   :  { %v797_v16 = vmul.f32 %v1308_v6, %v795_v15 }
 0xef1   :  { %799 = vrot.lane.b32.xlu1 %v797_v16, %s1380_s19 }
 0xefb   :  { %v815_v7 = vpop.permute.xlu0 %814 }
 0xefc   :  { %vm816_vm15 = vcmp.eq.s32.totalorder %v815_v7, 1 }
 0xf63   :  { %v800_v19 = vpop.permute.xlu1 %799 }
 0xf64   :  { %v802_v20 = vadd.f32 %v800_v19, %v792_v18 }
 0xf66   :  { %1309 = vtanh.f32 %v802_v20  ;;  %v818_v41 = vsel %vm816_vm15, %v802_v20, %v734_v17 }
 0xf73   :  { %v1310_v21 = vpop.eup %1309 }
 0xf74   :  { %805 = vrot.lane.b32.xlu1 %v1310_v21, %s1379_s5 }
 0xfe6   :  { %v806_v22 = vpop.permute.xlu1 %805 }
 0xfe7   :  { %v808_v23 = vmul.f32 %v1308_v6, %v806_v22 }
 0xfe9   :  { %v817_v24 = vsel %vm816_vm15, %v808_v23, %v733_v61 }
 0xfea   :  { %v821_v25 = vpack.c.bf16 %v817_v24, %v817_v24 }
 0xfec   :  { %823 = vrot.lane.b32.xlu0 %v821_v25, %s1380_s19 }
0x105e   :  { %v824_v26 = vpop.permute.xlu0 %823 }
0x105f   :  { %1228 = vmatmul.mubr.msk.bf16.vlgmr.msra.gmra.mxu0 %vm313_vm3, %v824_v26 }
0x111f   :  { %v862_v28 = vpop.f32.mrf.mxu0 }
0x1120   :  { %v868_v29 = vadd.f32 %v862_v28, %v820_v27 }
0x1121   :  { %v1229_v30 = vpop.f32.mrf.mxu0 }
0x1122   :  { %1311 = vtanh.f32 %v868_v29  ;;  %v1123_v35 = vmul.f32 -1.442695, %v868_v29 }
0x1123   :  { %v865_v31 = vpop.f32.mrf.mxu0 }
0x1124   :  { %1313 = vpow2.f32 %v1123_v35 }
0x1125   :  { %v1230_v32 = vpop.f32.mrf.mxu0 }
0x112f   :  { %v1312_v33 = vpop.eup %1311 }
0x1130   :  { %878 = vrot.lane.b32.xlu1 %v1312_v33, %s1379_s5 }
0x1131   :  { %v1314_v36 = vpop.eup %1313 }
0x1132   :  { %v872_v37 = vadd.f32 1.0, %v1314_v36 }
0x1134   :  { %898 = vperm.xlu1 %1258, %v896_v34   ;;  %1315 = vrcp.f32 %v872_v37 }
0x1141   :  { %v1316_v38 = vpop.eup %1315 }
0x1142   :  { %v876_v42 = vmul.f32 %v1316_v38, %v818_v41 }
0x11a2   :  { %v879_v39 = vpop.permute.xlu1 %878 }
0x11a3   :  { %v881_v40 = vmul.f32 %v1316_v38, %v879_v39 }
0x11a5   :  { %883 = vrot.lane.b32.xlu0 %v881_v40, %s1380_s19 }
0x11af   :  { %v899_v46 = vpop.permute.xlu1 %898 }
0x11b0   :  { %vm900_vm2 = vcmp.eq.s32.totalorder %v899_v46, 1 }
0x1217   :  { %v884_v43 = vpop.permute.xlu0 %883 }
0x1218   :  { %v886_v44 = vadd.f32 %v884_v43, %v876_v42 }
0x121a   :  { %1317 = vtanh.f32 %v886_v44  ;;  %v902_v9 = vsel %vm900_vm2, %v886_v44, %v818_v41 }
0x1227   :  { %v1318_v45 = vpop.eup %1317 }
0x1228   :  { %889 = vrot.lane.b32.xlu0 %v1318_v45, %s1379_s5 }
0x129a   :  { %v890_v47 = vpop.permute.xlu0 %889 }
0x129b   :  { %v892_v48 = vmul.f32 %v1316_v38, %v890_v47 }
0x129d   :  { %v901_v49 = vsel %vm900_vm2, %v892_v48, %v817_v24 }
0x129e   :  { %v905_v50 = vpack.c.bf16 %v901_v49, %v901_v49 }
0x12a0   :  { %907 = vrot.lane.b32.xlu1 %v905_v50, %s1380_s19 }
0x1312   :  { %v908_v51 = vpop.permute.xlu1 %907 }
0x1313   :  { %1236 = vmatmul.mubr.msk.bf16.vlgmr.msra.gmra.mxu1 %vm313_vm3, %v908_v51 }
0x13d3   :  { %v946_v53 = vpop.f32.mrf.mxu1 }
0x13d4   :  { %v952_v54 = vadd.f32 %v946_v53, %v904_v52 }
0x13d5   :  { %v1237_v55 = vpop.f32.mrf.mxu1 }
0x13d6   :  { %1319 = vtanh.f32 %v952_v54  ;;  %v1126_v61 = vmul.f32 -1.442695, %v952_v54 }
0x13d7   :  { %v949_v56 = vpop.f32.mrf.mxu1 }
0x13d8   :  { %1321 = vpow2.f32 %v1126_v61 }
0x13d9   :  { %v1238_v57 = vpop.f32.mrf.mxu1 }
0x13e3   :  { %v1320_v59 = vpop.eup %1319 }
0x13e4   :  { %962 = vrot.lane.b32.xlu0 %v1320_v59, %s1379_s5 }
0x13e5   :  { %v1322_v62 = vpop.eup %1321 }
0x13e6   :  { %v956_v63 = vadd.f32 1.0, %v1322_v62 }
0x13e8   :  { %982 = vperm.xlu0 %1259, %v980_v60   ;;  %1323 = vrcp.f32 %v956_v63 }
0x13f5   :  { %v1324_v3 = vpop.eup %1323 }
0x13f6   :  { %v960_v10 = vmul.f32 %v1324_v3, %v902_v9 }
0x1456   :  { %v963_v4 = vpop.permute.xlu0 %962 }
0x1457   :  { %v965_v8 = vmul.f32 %v1324_v3, %v963_v4 }
0x1459   :  { %967 = vrot.lane.b32.xlu1 %v965_v8, %s1380_s19 }
0x1463   :  { %v983_v5 = vpop.permute.xlu0 %982 }
0x1464   :  { %vm984_vm3 = vcmp.eq.s32.totalorder %v983_v5, 1 }
0x14cb   :  { %v968_v1 = vpop.permute.xlu1 %967 }
0x14cc   :  { %v970_v11 = vadd.f32 %v968_v1, %v960_v10 }
0x14ce   :  { %1325 = vtanh.f32 %v970_v11  ;;  %v986_v58 = vsel %vm984_vm3, %v970_v11, %v902_v9 }
0x14db   :  { %v1326_v12 = vpop.eup %1325 }
0x14dc   :  { %973 = vrot.lane.b32.xlu1 %v1326_v12, %s1379_s5 }
0x14e0   :  { %994 = vrot.lane.b32.xlu1 %v986_v58, %s1381_s22 }
0x154e   :  { %v974_v13 = vpop.permute.xlu1 %973 }
0x154f   :  { %v976_v2 = vmul.f32 %v1324_v3, %v974_v13 }
0x1551   :  { %v985_v14 = vsel %vm984_vm3, %v976_v2, %v901_v49 }
0x1552   :  { %988 = vrot.lane.b32.xlu0 %v985_v14, %s1380_s19  ;;  %v995_v6 = vpop.permute.xlu1 %994 }
0x1553   :  { %997 = vst.msk [vmem:[#allocation3] sm:$0x3] %vm46_vm0, %v995_v6 }
0x15c4   :  { %v989_v15 = vpop.permute.xlu0 %988 }
0x15c5   :  { %992 = vst.msk [vmem:[#allocation2] sm:$0x3] %vm46_vm0, %v989_v15 }
0x15c6 PF:  { %1239 = vmatprep.subr.bf16.mxu0 %v1374_v0  ;;  %v1327_v16 = vld [vmem:[%s1620_s6 + $0x8] sm:$0xff]   ;;  %vm1382_vm5 = vmmov 0   ;;  %v1328_v17 = vld [vmem:[%s1620_s6] sm:$0xff]   ;;  %vm1026_vm0 = vcmask 261120   ;;  %s1383_s28 = smov [#allocation10]   ;;  %vm1070_vm6 = vcmask 33792  }
0x15c7   :  { %1243 = vmatprep.mubr.msk.bf16.mxu0 %vm1382_vm5, %v1374_v0  ;;  %1240 = vmatpush3.bf16.msra.mxu0 %v1327_v16  ;;  %v1128_v20 = vld [vmem:[%s1621_s7] ss:$0 sm:$0xff]  ;;  %s1078_s29 = sshll.u32 %s1383_s28, 4  ;;  %s1079_s29 = int_to_ptr.vmem [resolvable:$true] %s1078_s29 }
0x15c8   :  { %1241 = vmatprep.subr.bf16.mxu0 %v1374_v0  ;;  %s1349_s6 = scalar_lea.vmem %s1079_s29, 32  ;;  %p1354_p7 = scmp.lt.s32.totalorder %s1079_s29, %s1079_s29 }
0x15c9   :  { %p1350_p6 = scmp.ne.s32.totalorder %s1079_s29, %s1349_s6  ;;  %p1355_p8 = scmp.lt.s32.totalorder %s1349_s6, %s1349_s6 }
0x15cb   :  { %1242 = vmatpush3.bf16.msra.mxu0 %v1328_v17  ;;  %p1356_p9 = por %p1355_p8, %p1354_p7 }
0x15cc   :  { %v1001_v18 = vld [vmem:[#allocation2] sm:$0x3] }
0x15cd   :  { %v1002_v19 = vpack.c.bf16 %v1001_v18, %v1001_v18  ;;  %p1357_p10 = pnand %p1356_p9, %p1350_p6 }
0x15cf   :  { %1244 = vmatmul.mubr.msk.bf16.vlgmr.msra.gmra.mxu0 %vm1026_vm0, %v1002_v19 }
0x168f   :  { %v1064_v21 = vpop.f32.mrf.mxu0 }
0x1690   :  { %v1065_v7 = vadd.f32 %v1128_v20, %v1064_v21 }
0x1691   :  { %v1245_v22 = vpop.f32.mrf.mxu0 }
0x1692   :  { %1071 = vst.msk [vmem:[#allocation10] sm:$0x3] %vm1070_vm6, %v1065_v7 }
0x1693   :  { %v1067_v23 = vpop.f32.mrf.mxu0 }
0x1694   :  { %1360 = shalt.err (!%p1357_p10)
}
0x1695   :  { %1081 = dma.vmem_to_hbm [thread:$0]  %s1079_s29, 32, %s1622_s8, [#allocation9]   ;;  %v1246_v0 = vpop.f32.mrf.mxu0 }
0x1696   :  { %1371 = dma.done.wait [#allocation9], 32  }
0x1697   :  { %1372 = vsyncadd [#allocation9], 4294967264 }
0x1698   :  { %1085 = vsyncpa [#allocation8], 1 }
0x1699   :  { %1086 = vsyncpa [#allocation9], 1 }

</bundles_post_ra>
